<compile_context>
chip_gen: v7x
topology: tpu7x:2x2x1
jax: 0.10.0
libtpu: 0.0.40
codegen_flags: <defaults>
</compile_context>

<pallas_src>
import functools

import jax
import jax.numpy as jnp
from jax.experimental import pallas as pl
from jax.experimental.pallas import tpu as pltpu

# ------------------------------------------------------------------ config --
N_BANDS = 16                          # PQMF(100 dB attenuation, 16 bands, polyphase)
TAPS    = 8                           # prototype taps per band -> filter length 128
FLEN    = N_BANDS * TAPS              # 128
FRAMES  = 128                         # frames per call -> MXU M dimension = 128
T       = FRAMES * N_BANDS            # 2048 audio samples
ACC_ROWS = FRAMES + TAPS - 1          # 135 polyphase rows (padded signal length / 16)
HIDDEN  = 32
LATENT  = 8
SEED    = 511990                      # matches self.seed in the PyTorch module

# analysis/synthesis delay of the synthesized PQMF; chosen block-aligned so the final
# crop falls on whole polyphase rows (rows CROP_ROW .. CROP_ROW+FRAMES of the slab).
PAD_L    = 4 * N_BANDS                # 64
PAD_R    = FLEN - N_BANDS - PAD_L     # 48
CROP_ROW = PAD_L // N_BANDS           # 4

assert FLEN == 128 and PAD_L % N_BANDS == 0
assert (T + PAD_L + PAD_R) == ACC_ROWS * N_BANDS

# advisory cost hint for the fused kernel
_FLOPS  = 2 * FRAMES * (FLEN * HIDDEN + HIDDEN * LATENT + LATENT * HIDDEN + HIDDEN * FLEN)
_TRANSC = 2 * FRAMES * HIDDEN
_BYTES  = 4 * (ACC_ROWS * N_BANDS              # polyphase blocks in
               + FLEN * HIDDEN + HIDDEN        # w0, eb1
               + HIDDEN * LATENT + LATENT      # ew2, eb2
               + LATENT * HIDDEN + HIDDEN      # dw1, db1
               + HIDDEN * FLEN + FLEN          # wsyn, bsyn
               + ACC_ROWS * N_BANDS + 1)       # overlap-add slab + loss out


# ------------------------------------------------------ fused Pallas kernel --
def _fused_fwd_kernel(blocks_ref, w0_ref, eb1_ref, ew2_ref, eb2_ref,
                      dw1_ref, db1_ref, wsyn_ref, bsyn_ref,
                      acc_ref, loss_ref):
    """Whole AudioAutoencoder forward in one kernel invocation.

    blocks_ref : (ACC_ROWS, N_BANDS)   polyphase view of the padded audio (im2col in-kernel)
    w0_ref     : (FLEN, HIDDEN)        PQMF analysis bank folded into encoder layer 1
    eb1/ew2/eb2/dw1/db1 : encoder / decoder parameters (frame-major)
    wsyn_ref   : (HIDDEN, FLEN)        decoder layer 2 folded into the synthesis bank
    bsyn_ref   : (1, FLEN)
    acc_ref    : (ACC_ROWS, N_BANDS)   overlap-added synthesis output (VMEM)
    loss_ref   : (1, 1)                latent regulariser mean(z*z)
    """
    f32 = jnp.float32

    # --- PQMF analysis + encoder layer 1 (folded) -----------------------------
    # frames[:, 16j:16j+16] == blocks[j:j+FRAMES, :]  =>
    # frames @ W0 == sum_j blocks[j:j+FRAMES] @ W0[16j:16j+16]   (im2col-free).
    h1_lin = jnp.zeros((FRAMES, HIDDEN), f32)
    for j in range(TAPS):                                     # unrolled at trace time
        h1_lin = h1_lin + jnp.dot(
            blocks_ref[j:j + FRAMES, :],
            w0_ref[j * N_BANDS:(j + 1) * N_BANDS, :],
            preferred_element_type=f32)
    h1 = jnp.tanh(h1_lin + eb1_ref[...])                      # (FRAMES, 32)

    # --- encoder layer 2 + latent regulariser (reduced fully in-kernel) -------
    z = jnp.dot(h1, ew2_ref[...], preferred_element_type=f32) + eb2_ref[...]   # (F, 8)
    zz = jnp.sum(jnp.sum(z * z, axis=1, keepdims=True), axis=0, keepdims=True)
    loss_ref[...] = zz * (1.0 / float(FRAMES * LATENT))       # mean(z*z), shape (1,1)

    # --- decoder layer 1 -------------------------------------------------------
    h2 = jnp.tanh(jnp.dot(z, dw1_ref[...], preferred_element_type=f32)
                  + db1_ref[...])                              # (FRAMES, 32)

    # --- decoder layer 2 + PQMF synthesis (folded): one lane-dense N=128 matmul
    # syn[:, 16j:16j+16] is the tap-j contribution of every frame.
    syn = jnp.dot(h2, wsyn_ref[...], preferred_element_type=f32) + bsyn_ref[...]  # (F,128)

    # --- overlap-add: acc[f + j, :] += syn[f, 16j:16j+16] ----------------------
    # 8 statically unrolled shifted adds into the VMEM output ref; no shift-matrix
    # matmuls and no 552 KB shift constant DMA.
    acc_ref[...] = jnp.zeros(acc_ref.shape, f32)
    for j in range(TAPS):                                     # unrolled at trace time
        acc_ref[j:j + FRAMES, :] = (acc_ref[j:j + FRAMES, :]
                                    + syn[:, j * N_BANDS:(j + 1) * N_BANDS])

    # TODO(synk): on v6e/v7x cast the MXU operands (blocks/h1/h2 and the MLP weights)
    # to bf16 with f32 accumulation, keep the folded PQMF banks in f32; when batching
    # clips / tiling long audio, add a leading grid axis with
    # dimension_semantics=("parallel",) so v7x's second TensorCore is used.


def fused_forward(blocks, c):
    """One pallas_call for the whole autoencoder; everything VMEM-resident."""
    acc, loss = pl.pallas_call(
        _fused_fwd_kernel,
        out_shape=(
            jax.ShapeDtypeStruct((ACC_ROWS, N_BANDS), jnp.float32),
            jax.ShapeDtypeStruct((1, 1), jnp.float32),
        ),
        in_specs=[pl.BlockSpec(memory_space=pltpu.MemorySpace.VMEM)] * 9,
        out_specs=(
            pl.BlockSpec(memory_space=pltpu.MemorySpace.VMEM),
            pl.BlockSpec(memory_space=pltpu.MemorySpace.VMEM),
        ),
        cost_estimate=pl.CostEstimate(
            flops=_FLOPS, transcendentals=_TRANSC, bytes_accessed=_BYTES),
    )(blocks, c["w0"], c["enc_b1"], c["enc_w2"], c["enc_b2"],
      c["dec_w1"], c["dec_b1"], c["wsyn"], c["bsyn"])
    return acc, loss[0, 0]


# -------------------------------------------------------------- PQMF design --
def design_pqmf(n_bands=N_BANDS, taps=TAPS):
    """Cosine-modulated pseudo-QMF filterbank (deterministic prototype)."""
    L = n_bands * taps
    n = jnp.arange(L, dtype=jnp.float32)
    m = n - (L - 1) / 2.0
    cutoff = 1.0 / (2.0 * n_bands)
    sinc = jnp.where(m == 0.0,
                     2.0 * cutoff,
                     jnp.sin(2.0 * jnp.pi * cutoff * m) / (jnp.pi * m))
    window = 0.5 - 0.5 * jnp.cos(2.0 * jnp.pi * n / (L - 1))   # Hann
    proto = sinc * window

    k = jnp.arange(n_bands, dtype=jnp.float32)[:, None]
    phase = ((-1.0) ** k) * (jnp.pi / 4.0)
    arg = (jnp.pi / n_bands) * (k + 0.5) * (n[None, :] - (L - 1) / 2.0)
    H = 2.0 * proto[None, :] * jnp.cos(arg + phase)    # analysis  (n_bands, L)
    G = 2.0 * proto[None, :] * jnp.cos(arg - phase)    # synthesis (n_bands, L)
    return H.astype(jnp.float32), G.astype(jnp.float32)


# ------------------------------------------------- parameters / constants ----
def build_constants(seed=SEED):
    key = jax.random.PRNGKey(seed)
    ks = jax.random.split(key, 8)

    def lin(kw, kb, fan_in, fan_out):
        w = jax.random.normal(kw, (fan_in, fan_out), jnp.float32) / jnp.sqrt(fan_in)
        b = 0.01 * jax.random.normal(kb, (1, fan_out), jnp.float32)
        return w, b

    enc_w1, enc_b1 = lin(ks[0], ks[1], N_BANDS, HIDDEN)
    enc_w2, enc_b2 = lin(ks[2], ks[3], HIDDEN, LATENT)
    dec_w1, dec_b1 = lin(ks[4], ks[5], LATENT, HIDDEN)
    dec_w2, dec_b2 = lin(ks[6], ks[7], HIDDEN, N_BANDS)

    H, G = design_pqmf()
    gw = N_BANDS * G                                    # synthesis bank (N_BANDS, FLEN)

    return {
        # PQMF analysis folded into encoder layer 1
        "w0":     (H.T @ enc_w1).astype(jnp.float32),   # (FLEN, HIDDEN)
        "enc_b1": enc_b1,
        "enc_w2": enc_w2, "enc_b2": enc_b2,
        "dec_w1": dec_w1, "dec_b1": dec_b1,
        # decoder layer 2 folded into the synthesis bank (lane-dense N=128)
        "wsyn":   (dec_w2 @ gw).astype(jnp.float32),    # (HIDDEN, FLEN)
        "bsyn":   (dec_b2 @ gw).astype(jnp.float32),    # (1, FLEN)
    }


# --------------------------------------------------------------- glue --------
def pqmf_polyphase_blocks(x):
    """(1, 1, T) -> (ACC_ROWS, N_BANDS) polyphase blocks (~8.6 KB); pure reshape glue.
    The K=128 im2col frames are assembled inside the kernel from sublane slices."""
    sig = x[0, 0]
    sig_p = jnp.pad(sig, (PAD_L, PAD_R))
    return sig_p.reshape(ACC_ROWS, N_BANDS)


def audio_autoencoder_forward(x, c):
    blocks = pqmf_polyphase_blocks(x)          # pqmf.forward(x) polyphase framing
    acc, loss = fused_forward(blocks, c)       # analysis/enc/dec/synthesis + overlap-add
    # centered crop (pqmf.inverse delay trim), block-aligned so it is a whole-row slice
    # TODO(synk): emit this crop from the kernel as a lane-dense (16,128) slab once the
    # (128,16)->(16,128) in-kernel relayout is worth the extra Mosaic reshape.
    rec = acc[CROP_ROW:CROP_ROW + FRAMES].reshape(1, 1, T)
    return rec, loss                           # ((1,1,T), scalar loss_component)


# -------------------------------------------------------------------- main ---
if __name__ == "__main__":
    consts = build_constants(SEED)
    x = jax.random.normal(jax.random.PRNGKey(0), (1, 1, T), jnp.float32)

    fwd = jax.jit(functools.partial(audio_autoencoder_forward, c=consts))
    out, loss = fwd(x)
    out, loss = jax.block_until_ready((out, loss))

    assert out.shape == (1, 1, T), out.shape
    assert loss.shape == (), loss.shape
    assert bool(jnp.isfinite(out).all()) and bool(jnp.isfinite(loss))
    print("KERNEL_OK")
</pallas_src>

<mosaic_0001>
module attributes {stable_mosaic.version = 11 : i64} {
  func.func @_fused_fwd_kernel(%arg0: memref<135x16xf32, #tpu.memory_space<vmem>>, %arg1: memref<128x32xf32, #tpu.memory_space<vmem>>, %arg2: memref<1x32xf32, #tpu.memory_space<vmem>>, %arg3: memref<32x8xf32, #tpu.memory_space<vmem>>, %arg4: memref<1x8xf32, #tpu.memory_space<vmem>>, %arg5: memref<8x32xf32, #tpu.memory_space<vmem>>, %arg6: memref<1x32xf32, #tpu.memory_space<vmem>>, %arg7: memref<32x128xf32, #tpu.memory_space<vmem>>, %arg8: memref<1x128xf32, #tpu.memory_space<vmem>>, %arg9: memref<135x16xf32, #tpu.memory_space<vmem>>, %arg10: memref<1x1xf32, #tpu.memory_space<vmem>>) attributes {dimension_semantics = [], scalar_prefetch = 0 : i64, scratch_operands = 0 : i64, tpu.core_type = #tpu.core_type<tc>} {
    %cst = arith.constant 0.000000e+00 : f32
    %0 = vector.broadcast %cst : f32 to vector<128x32xf32>
    %c0 = arith.constant 0 : index
    %c0_0 = arith.constant 0 : index
    %1 = vector.load %arg0[%c0, %c0_0] : memref<135x16xf32, #tpu.memory_space<vmem>>, vector<128x16xf32>
    %c0_1 = arith.constant 0 : index
    %c0_2 = arith.constant 0 : index
    %2 = vector.load %arg1[%c0_1, %c0_2] : memref<128x32xf32, #tpu.memory_space<vmem>>, vector<16x32xf32>
    %cst_3 = arith.constant dense<0.000000e+00> : vector<128x32xf32>
    %3 = tpu.matmul %1, %2, %cst_3 {dimension_numbers = #tpu.dot_dimension_numbers<[1], [0], [0], [1], [0, 0, 1, 1], [], []>} : vector<128x16xf32>, vector<16x32xf32>, vector<128x32xf32> -> vector<128x32xf32>
    %4 = arith.addf %0, %3 : vector<128x32xf32>
    %c1 = arith.constant 1 : index
    %c0_4 = arith.constant 0 : index
    %5 = vector.load %arg0[%c1, %c0_4] : memref<135x16xf32, #tpu.memory_space<vmem>>, vector<128x16xf32>
    %c16 = arith.constant 16 : index
    %c0_5 = arith.constant 0 : index
    %6 = vector.load %arg1[%c16, %c0_5] : memref<128x32xf32, #tpu.memory_space<vmem>>, vector<16x32xf32>
    %cst_6 = arith.constant dense<0.000000e+00> : vector<128x32xf32>
    %7 = tpu.matmul %5, %6, %cst_6 {dimension_numbers = #tpu.dot_dimension_numbers<[1], [0], [0], [1], [0, 0, 1, 1], [], []>} : vector<128x16xf32>, vector<16x32xf32>, vector<128x32xf32> -> vector<128x32xf32>
    %8 = arith.addf %4, %7 : vector<128x32xf32>
    %c2 = arith.constant 2 : index
    %c0_7 = arith.constant 0 : index
    %9 = vector.load %arg0[%c2, %c0_7] : memref<135x16xf32, #tpu.memory_space<vmem>>, vector<128x16xf32>
    %c32 = arith.constant 32 : index
    %c0_8 = arith.constant 0 : index
    %10 = vector.load %arg1[%c32, %c0_8] : memref<128x32xf32, #tpu.memory_space<vmem>>, vector<16x32xf32>
    %cst_9 = arith.constant dense<0.000000e+00> : vector<128x32xf32>
    %11 = tpu.matmul %9, %10, %cst_9 {dimension_numbers = #tpu.dot_dimension_numbers<[1], [0], [0], [1], [0, 0, 1, 1], [], []>} : vector<128x16xf32>, vector<16x32xf32>, vector<128x32xf32> -> vector<128x32xf32>
    %12 = arith.addf %8, %11 : vector<128x32xf32>
    %c3 = arith.constant 3 : index
    %c0_10 = arith.constant 0 : index
    %13 = vector.load %arg0[%c3, %c0_10] : memref<135x16xf32, #tpu.memory_space<vmem>>, vector<128x16xf32>
    %c48 = arith.constant 48 : index
    %c0_11 = arith.constant 0 : index
    %14 = vector.load %arg1[%c48, %c0_11] : memref<128x32xf32, #tpu.memory_space<vmem>>, vector<16x32xf32>
    %cst_12 = arith.constant dense<0.000000e+00> : vector<128x32xf32>
    %15 = tpu.matmul %13, %14, %cst_12 {dimension_numbers = #tpu.dot_dimension_numbers<[1], [0], [0], [1], [0, 0, 1, 1], [], []>} : vector<128x16xf32>, vector<16x32xf32>, vector<128x32xf32> -> vector<128x32xf32>
    %16 = arith.addf %12, %15 : vector<128x32xf32>
    %c4 = arith.constant 4 : index
    %c0_13 = arith.constant 0 : index
    %17 = vector.load %arg0[%c4, %c0_13] : memref<135x16xf32, #tpu.memory_space<vmem>>, vector<128x16xf32>
    %c64 = arith.constant 64 : index
    %c0_14 = arith.constant 0 : index
    %18 = vector.load %arg1[%c64, %c0_14] : memref<128x32xf32, #tpu.memory_space<vmem>>, vector<16x32xf32>
    %cst_15 = arith.constant dense<0.000000e+00> : vector<128x32xf32>
    %19 = tpu.matmul %17, %18, %cst_15 {dimension_numbers = #tpu.dot_dimension_numbers<[1], [0], [0], [1], [0, 0, 1, 1], [], []>} : vector<128x16xf32>, vector<16x32xf32>, vector<128x32xf32> -> vector<128x32xf32>
    %20 = arith.addf %16, %19 : vector<128x32xf32>
    %c5 = arith.constant 5 : index
    %c0_16 = arith.constant 0 : index
    %21 = vector.load %arg0[%c5, %c0_16] : memref<135x16xf32, #tpu.memory_space<vmem>>, vector<128x16xf32>
    %c80 = arith.constant 80 : index
    %c0_17 = arith.constant 0 : index
    %22 = vector.load %arg1[%c80, %c0_17] : memref<128x32xf32, #tpu.memory_space<vmem>>, vector<16x32xf32>
    %cst_18 = arith.constant dense<0.000000e+00> : vector<128x32xf32>
    %23 = tpu.matmul %21, %22, %cst_18 {dimension_numbers = #tpu.dot_dimension_numbers<[1], [0], [0], [1], [0, 0, 1, 1], [], []>} : vector<128x16xf32>, vector<16x32xf32>, vector<128x32xf32> -> vector<128x32xf32>
    %24 = arith.addf %20, %23 : vector<128x32xf32>
    %c6 = arith.constant 6 : index
    %c0_19 = arith.constant 0 : index
    %25 = vector.load %arg0[%c6, %c0_19] : memref<135x16xf32, #tpu.memory_space<vmem>>, vector<128x16xf32>
    %c96 = arith.constant 96 : index
    %c0_20 = arith.constant 0 : index
    %26 = vector.load %arg1[%c96, %c0_20] : memref<128x32xf32, #tpu.memory_space<vmem>>, vector<16x32xf32>
    %cst_21 = arith.constant dense<0.000000e+00> : vector<128x32xf32>
    %27 = tpu.matmul %25, %26, %cst_21 {dimension_numbers = #tpu.dot_dimension_numbers<[1], [0], [0], [1], [0, 0, 1, 1], [], []>} : vector<128x16xf32>, vector<16x32xf32>, vector<128x32xf32> -> vector<128x32xf32>
    %28 = arith.addf %24, %27 : vector<128x32xf32>
    %c7 = arith.constant 7 : index
    %c0_22 = arith.constant 0 : index
    %29 = vector.load %arg0[%c7, %c0_22] : memref<135x16xf32, #tpu.memory_space<vmem>>, vector<128x16xf32>
    %c112 = arith.constant 112 : index
    %c0_23 = arith.constant 0 : index
    %30 = vector.load %arg1[%c112, %c0_23] : memref<128x32xf32, #tpu.memory_space<vmem>>, vector<16x32xf32>
    %cst_24 = arith.constant dense<0.000000e+00> : vector<128x32xf32>
    %31 = tpu.matmul %29, %30, %cst_24 {dimension_numbers = #tpu.dot_dimension_numbers<[1], [0], [0], [1], [0, 0, 1, 1], [], []>} : vector<128x16xf32>, vector<16x32xf32>, vector<128x32xf32> -> vector<128x32xf32>
    %32 = arith.addf %28, %31 : vector<128x32xf32>
    %c0_25 = arith.constant 0 : index
    %c0_26 = arith.constant 0 : index
    %33 = vector.load %arg2[%c0_25, %c0_26] : memref<1x32xf32, #tpu.memory_space<vmem>>, vector<1x32xf32>
    %34 = vector.broadcast %33 : vector<1x32xf32> to vector<128x32xf32>
    %35 = arith.addf %32, %34 : vector<128x32xf32>
    %36 = math.tanh %35 : vector<128x32xf32>
    %c0_27 = arith.constant 0 : index
    %c0_28 = arith.constant 0 : index
    %37 = vector.load %arg3[%c0_27, %c0_28] : memref<32x8xf32, #tpu.memory_space<vmem>>, vector<32x8xf32>
    %cst_29 = arith.constant dense<0.000000e+00> : vector<128x8xf32>
    %38 = tpu.matmul %36, %37, %cst_29 {dimension_numbers = #tpu.dot_dimension_numbers<[1], [0], [0], [1], [0, 0, 1, 1], [], []>} : vector<128x32xf32>, vector<32x8xf32>, vector<128x8xf32> -> vector<128x8xf32>
    %c0_30 = arith.constant 0 : index
    %c0_31 = arith.constant 0 : index
    %39 = vector.load %arg4[%c0_30, %c0_31] : memref<1x8xf32, #tpu.memory_space<vmem>>, vector<1x8xf32>
    %40 = vector.broadcast %39 : vector<1x8xf32> to vector<128x8xf32>
    %41 = arith.addf %38, %40 : vector<128x8xf32>
    %42 = arith.mulf %41, %41 : vector<128x8xf32>
    %cst_32 = arith.constant dense<0.000000e+00> : vector<128xf32>
    %43 = vector.multi_reduction <add>, %42, %cst_32 [1] : vector<128x8xf32> to vector<128xf32>
    %44 = vector.shape_cast %43 : vector<128xf32> to vector<128x1xf32>
    %cst_33 = arith.constant dense<0.000000e+00> : vector<1xf32>
    %45 = vector.multi_reduction <add>, %44, %cst_33 [0] : vector<128x1xf32> to vector<1xf32>
    %46 = vector.shape_cast %45 : vector<1xf32> to vector<1x1xf32>
    %cst_34 = arith.constant 9.765625E-4 : f32
    %47 = vector.broadcast %cst_34 : f32 to vector<1x1xf32>
    %48 = arith.mulf %46, %47 : vector<1x1xf32>
    %c0_35 = arith.constant 0 : index
    %c0_36 = arith.constant 0 : index
    %49 = vector.load %arg10[%c0_35, %c0_36] : memref<1x1xf32, #tpu.memory_space<vmem>>, vector<1x1xf32>
    tpu.vector_store %arg10[%c0_35, %c0_36], %48 {strides = array<i32>} : memref<1x1xf32, #tpu.memory_space<vmem>>, vector<1x1xf32>,
    %c0_37 = arith.constant 0 : index
    %c0_38 = arith.constant 0 : index
    %50 = vector.load %arg5[%c0_37, %c0_38] : memref<8x32xf32, #tpu.memory_space<vmem>>, vector<8x32xf32>
    %cst_39 = arith.constant dense<0.000000e+00> : vector<128x32xf32>
    %51 = tpu.matmul %41, %50, %cst_39 {dimension_numbers = #tpu.dot_dimension_numbers<[1], [0], [0], [1], [0, 0, 1, 1], [], []>} : vector<128x8xf32>, vector<8x32xf32>, vector<128x32xf32> -> vector<128x32xf32>
    %c0_40 = arith.constant 0 : index
    %c0_41 = arith.constant 0 : index
    %52 = vector.load %arg6[%c0_40, %c0_41] : memref<1x32xf32, #tpu.memory_space<vmem>>, vector<1x32xf32>
    %53 = vector.broadcast %52 : vector<1x32xf32> to vector<128x32xf32>
    %54 = arith.addf %51, %53 : vector<128x32xf32>
    %55 = math.tanh %54 : vector<128x32xf32>
    %c0_42 = arith.constant 0 : index
    %c0_43 = arith.constant 0 : index
    %56 = vector.load %arg7[%c0_42, %c0_43] : memref<32x128xf32, #tpu.memory_space<vmem>>, vector<32x128xf32>
    %cst_44 = arith.constant dense<0.000000e+00> : vector<128x128xf32>
    %57 = tpu.matmul %55, %56, %cst_44 {dimension_numbers = #tpu.dot_dimension_numbers<[1], [0], [0], [1], [0, 0, 1, 1], [], []>} : vector<128x32xf32>, vector<32x128xf32>, vector<128x128xf32> -> vector<128x128xf32>
    %c0_45 = arith.constant 0 : index
    %c0_46 = arith.constant 0 : index
    %58 = vector.load %arg8[%c0_45, %c0_46] : memref<1x128xf32, #tpu.memory_space<vmem>>, vector<1x128xf32>
    %59 = vector.broadcast %58 : vector<1x128xf32> to vector<128x128xf32>
    %60 = arith.addf %57, %59 : vector<128x128xf32>
    %cst_47 = arith.constant 0.000000e+00 : f32
    %61 = vector.broadcast %cst_47 : f32 to vector<135x16xf32>
    %c0_48 = arith.constant 0 : index
    %c0_49 = arith.constant 0 : index
    %62 = vector.load %arg9[%c0_48, %c0_49] : memref<135x16xf32, #tpu.memory_space<vmem>>, vector<135x16xf32>
    tpu.vector_store %arg9[%c0_48, %c0_49], %61 {strides = array<i32>} : memref<135x16xf32, #tpu.memory_space<vmem>>, vector<135x16xf32>,
    %c0_50 = arith.constant 0 : index
    %c0_51 = arith.constant 0 : index
    %63 = vector.load %arg9[%c0_50, %c0_51] : memref<135x16xf32, #tpu.memory_space<vmem>>, vector<128x16xf32>
    %64 = vector.extract_strided_slice %60 {offsets = [0, 0], sizes = [128, 16], strides = [1, 1]} : vector<128x128xf32> to vector<128x16xf32>
    %65 = arith.addf %63, %64 : vector<128x16xf32>
    %c0_52 = arith.constant 0 : index
    %c0_53 = arith.constant 0 : index
    %66 = vector.load %arg9[%c0_52, %c0_53] : memref<135x16xf32, #tpu.memory_space<vmem>>, vector<128x16xf32>
    tpu.vector_store %arg9[%c0_52, %c0_53], %65 {strides = array<i32>} : memref<135x16xf32, #tpu.memory_space<vmem>>, vector<128x16xf32>,
    %c1_54 = arith.constant 1 : index
    %c0_55 = arith.constant 0 : index
    %67 = vector.load %arg9[%c1_54, %c0_55] : memref<135x16xf32, #tpu.memory_space<vmem>>, vector<128x16xf32>
    %68 = vector.extract_strided_slice %60 {offsets = [0, 16], sizes = [128, 16], strides = [1, 1]} : vector<128x128xf32> to vector<128x16xf32>
    %69 = arith.addf %67, %68 : vector<128x16xf32>
    %c1_56 = arith.constant 1 : index
    %c0_57 = arith.constant 0 : index
    %70 = vector.load %arg9[%c1_56, %c0_57] : memref<135x16xf32, #tpu.memory_space<vmem>>, vector<128x16xf32>
    tpu.vector_store %arg9[%c1_56, %c0_57], %69 {strides = array<i32>} : memref<135x16xf32, #tpu.memory_space<vmem>>, vector<128x16xf32>,
    %c2_58 = arith.constant 2 : index
    %c0_59 = arith.constant 0 : index
    %71 = vector.load %arg9[%c2_58, %c0_59] : memref<135x16xf32, #tpu.memory_space<vmem>>, vector<128x16xf32>
    %72 = vector.extract_strided_slice %60 {offsets = [0, 32], sizes = [128, 16], strides = [1, 1]} : vector<128x128xf32> to vector<128x16xf32>
    %73 = arith.addf %71, %72 : vector<128x16xf32>
    %c2_60 = arith.constant 2 : index
    %c0_61 = arith.constant 0 : index
    %74 = vector.load %arg9[%c2_60, %c0_61] : memref<135x16xf32, #tpu.memory_space<vmem>>, vector<128x16xf32>
    tpu.vector_store %arg9[%c2_60, %c0_61], %73 {strides = array<i32>} : memref<135x16xf32, #tpu.memory_space<vmem>>, vector<128x16xf32>,
    %c3_62 = arith.constant 3 : index
    %c0_63 = arith.constant 0 : index
    %75 = vector.load %arg9[%c3_62, %c0_63] : memref<135x16xf32, #tpu.memory_space<vmem>>, vector<128x16xf32>
    %76 = vector.extract_strided_slice %60 {offsets = [0, 48], sizes = [128, 16], strides = [1, 1]} : vector<128x128xf32> to vector<128x16xf32>
    %77 = arith.addf %75, %76 : vector<128x16xf32>
    %c3_64 = arith.constant 3 : index
    %c0_65 = arith.constant 0 : index
    %78 = vector.load %arg9[%c3_64, %c0_65] : memref<135x16xf32, #tpu.memory_space<vmem>>, vector<128x16xf32>
    tpu.vector_store %arg9[%c3_64, %c0_65], %77 {strides = array<i32>} : memref<135x16xf32, #tpu.memory_space<vmem>>, vector<128x16xf32>,
    %c4_66 = arith.constant 4 : index
    %c0_67 = arith.constant 0 : index
    %79 = vector.load %arg9[%c4_66, %c0_67] : memref<135x16xf32, #tpu.memory_space<vmem>>, vector<128x16xf32>
    %80 = vector.extract_strided_slice %60 {offsets = [0, 64], sizes = [128, 16], strides = [1, 1]} : vector<128x128xf32> to vector<128x16xf32>
    %81 = arith.addf %79, %80 : vector<128x16xf32>
    %c4_68 = arith.constant 4 : index
    %c0_69 = arith.constant 0 : index
    %82 = vector.load %arg9[%c4_68, %c0_69] : memref<135x16xf32, #tpu.memory_space<vmem>>, vector<128x16xf32>
    tpu.vector_store %arg9[%c4_68, %c0_69], %81 {strides = array<i32>} : memref<135x16xf32, #tpu.memory_space<vmem>>, vector<128x16xf32>,
    %c5_70 = arith.constant 5 : index
    %c0_71 = arith.constant 0 : index
    %83 = vector.load %arg9[%c5_70, %c0_71] : memref<135x16xf32, #tpu.memory_space<vmem>>, vector<128x16xf32>
    %84 = vector.extract_strided_slice %60 {offsets = [0, 80], sizes = [128, 16], strides = [1, 1]} : vector<128x128xf32> to vector<128x16xf32>
    %85 = arith.addf %83, %84 : vector<128x16xf32>
    %c5_72 = arith.constant 5 : index
    %c0_73 = arith.constant 0 : index
    %86 = vector.load %arg9[%c5_72, %c0_73] : memref<135x16xf32, #tpu.memory_space<vmem>>, vector<128x16xf32>
    tpu.vector_store %arg9[%c5_72, %c0_73], %85 {strides = array<i32>} : memref<135x16xf32, #tpu.memory_space<vmem>>, vector<128x16xf32>,
    %c6_74 = arith.constant 6 : index
    %c0_75 = arith.constant 0 : index
    %87 = vector.load %arg9[%c6_74, %c0_75] : memref<135x16xf32, #tpu.memory_space<vmem>>, vector<128x16xf32>
    %88 = vector.extract_strided_slice %60 {offsets = [0, 96], sizes = [128, 16], strides = [1, 1]} : vector<128x128xf32> to vector<128x16xf32>
    %89 = arith.addf %87, %88 : vector<128x16xf32>
    %c6_76 = arith.constant 6 : index
    %c0_77 = arith.constant 0 : index
    %90 = vector.load %arg9[%c6_76, %c0_77] : memref<135x16xf32, #tpu.memory_space<vmem>>, vector<128x16xf32>
    tpu.vector_store %arg9[%c6_76, %c0_77], %89 {strides = array<i32>} : memref<135x16xf32, #tpu.memory_space<vmem>>, vector<128x16xf32>,
    %c7_78 = arith.constant 7 : index
    %c0_79 = arith.constant 0 : index
    %91 = vector.load %arg9[%c7_78, %c0_79] : memref<135x16xf32, #tpu.memory_space<vmem>>, vector<128x16xf32>
    %92 = vector.extract_strided_slice %60 {offsets = [0, 112], sizes = [128, 16], strides = [1, 1]} : vector<128x128xf32> to vector<128x16xf32>
    %93 = arith.addf %91, %92 : vector<128x16xf32>
    %c7_80 = arith.constant 7 : index
    %c0_81 = arith.constant 0 : index
    %94 = vector.load %arg9[%c7_80, %c0_81] : memref<135x16xf32, #tpu.memory_space<vmem>>, vector<128x16xf32>
    tpu.vector_store %arg9[%c7_80, %c0_81], %93 {strides = array<i32>} : memref<135x16xf32, #tpu.memory_space<vmem>>, vector<128x16xf32>,
    return
  }
}

</mosaic_0001>

<bundles_post_ra>
// kernel: audio_autoencoder_forward.1
= control target key start
LH: loop header
LB: loop body
LE: loop exit
PB: predicated region body
PF: predicated region fallthrough
CT: control target
= control target key end

     0   :  { %vm71_vm0 = vcmask 130048   ;;  %s6552_s0 = inlined_call_operand.vmem [shape: f32[135,16], index: 0, kind: input, shape index: {}]   ;;  %s6553_s1 = inlined_call_operand.vmem [shape: f32[128,32], index: 1, kind: input, shape index: {}]   ;;  %s6554_s2 = inlined_call_operand.vmem [shape: f32[1,32], index: 2, kind: input, shape index: {}]   ;;  %s6555_s3 = inlined_call_operand.vmem [shape: f32[32,8], index: 3, kind: input, shape index: {}]   ;;  %s6556_s4 = inlined_call_operand.vmem [shape: f32[1,8], index: 4, kind: input, shape index: {}]   ;;  %s6557_s5 = inlined_call_operand.vmem [shape: f32[8,32], index: 5, kind: input, shape index: {}]   ;;  %s6558_s6 = inlined_call_operand.vmem [shape: f32[1,32], index: 6, kind: input, shape index: {}]   ;;  %s6559_s7 = inlined_call_operand.vmem [shape: f32[32,128], index: 7, kind: input, shape index: {}]   ;;  %s6560_s8 = inlined_call_operand.vmem [shape: f32[1,128], index: 8, kind: input, shape index: {}]   ;;  %s6561_s9 = inlined_call_operand.vmem [shape: f32[135,16], index: 9, kind: output, shape index: {0}]   ;;  %s6562_s10 = inlined_call_operand.hbm [shape: f32[1,1], index: 10, kind: output, shape index: {1}]  }
   0x1   :  { %v474_v0 = vld [vmem:[%s6553_s1 + $0x20] sm:$0xff]  ;;  %v475_v1 = vld [vmem:[%s6553_s1 + $0x28] sm:$0xff]  ;;  %v701_v4 = vld [vmem:[%s6553_s1 + $0x30] sm:$0xff] }
   0x2   :  { %v458_v2 = vld [vmem:[%s6552_s0 + $0x2] sm:$0xff]  ;;  %v4373_v3 = vpack.c.bf16 %v475_v1, %v474_v0  ;;  %v702_v5 = vld [vmem:[%s6553_s1 + $0x38] sm:$0xff]  ;;  %v459_v7 = vld [vmem:[%s6552_s0 + $0xa] sm:$0xff] }
   0x3   :  { %3787 = vmatprep.mubr.msk.f32.mxu0 %vm71_vm0, %v458_v2  ;;  %v4053_v6 = vpack.c.bf16 %v702_v5, %v701_v4  ;;  %v928_v8 = vld [vmem:[%s6553_s1 + $0x40] sm:$0xff]  ;;  %v460_v9 = vld [vmem:[%s6552_s0 + $0x12] sm:$0xff]  ;;  %v929_v10 = vld [vmem:[%s6553_s1 + $0x48] sm:$0xff] }
   0x4   :  { %4050 = vmatprep.subr.bf16.mxu0 %v4373_v3  ;;  %v4057_v11 = vpack.c.bf16 %v929_v10, %v928_v8  ;;  %v461_v12 = vld [vmem:[%s6552_s0 + $0x1a] sm:$0xff]  ;;  %v462_v13 = vld [vmem:[%s6552_s0 + $0x22] sm:$0xff]  ;;  %v463_v14 = vld [vmem:[%s6552_s0 + $0x2a] sm:$0xff] }
   0x5   :  { %4052 = vmatpush3.bf16.msra.mxu0 %v4373_v3  ;;  %v464_v15 = vld [vmem:[%s6552_s0 + $0x32] sm:$0xff]  ;;  %v53_v19 = vld [vmem:[%s6552_s0 + $0x1] sm:$0xff]  ;;  %v54_v22 = vld [vmem:[%s6552_s0 + $0x9] sm:$0xff] }
   0x6   :  { %4054 = vmatprep.subr.bf16.mxu0 %v4053_v6  ;;  %v69_v16 = vld [vmem:[%s6553_s1 + $0x10] sm:$0xff]  ;;  %v70_v17 = vld [vmem:[%s6553_s1 + $0x18] sm:$0xff]  ;;  %3731 = vmatprep.mubr.msk.f32.mxu1 %vm71_vm0, %v53_v19  ;;  %v685_v21 = vld [vmem:[%s6552_s0 + $0x3] sm:$0xff] }
   0x7   :  { %v4041_v18 = vpack.c.bf16 %v70_v17, %v69_v16  ;;  %v465_v20 = vld [vmem:[%s6552_s0 + $0x3a] sm:$0xff]  ;;  %v1155_v23 = vld [vmem:[%s6553_s1 + $0x50] sm:$0xff]  ;;  %v689_v32 = vld [vmem:[%s6552_s0 + $0x23] sm:$0xff] }
   0x8   :  { %3788 = vmatmul.mubr.msk.f32.vlgmr.msra.gmra.mrb[0].mxu0 %vm71_vm0, %v459_v7  ;;  %v1156_v24 = vld [vmem:[%s6553_s1 + $0x58] sm:$0xff]  ;;  %v686_v26 = vld [vmem:[%s6552_s0 + $0xb] sm:$0xff]  ;;  %v57_v30 = vld [vmem:[%s6552_s0 + $0x21] sm:$0xff] }
   0x9   :  { %4056 = vmatpush3.bf16.msra.mxu0 %v4053_v6  ;;  %3790 = vmatprep.mubr.msk.f32.mxu0 %vm71_vm0, %v460_v9  ;;  %v55_v25 = vld [vmem:[%s6552_s0 + $0x11] sm:$0xff]  ;;  %v4451_v28 = vpack.c.bf16 %v1156_v24, %v1155_v23  ;;  %v56_v29 = vld [vmem:[%s6552_s0 + $0x19] sm:$0xff]  ;;  %v52_v34 = vld [vmem:[%s6553_s1 + $0x8] sm:$0xff] }
   0xa   :  { %4058 = vmatprep.subr.bf16.mxu0 %v4057_v11  ;;  %4042 = vmatprep.subr.bf16.mxu1 %v4041_v18  ;;  %v687_v27 = vld [vmem:[%s6552_s0 + $0x13] sm:$0xff]  ;;  %v688_v31 = vld [vmem:[%s6552_s0 + $0x1b] sm:$0xff]  ;;  %v58_v35 = vld [vmem:[%s6552_s0 + $0x29] sm:$0xff] }
   0xb   :  { %4044 = vmatpush3.bf16.msra.mxu1 %v4041_v18  ;;  %v51_v33 = vld [vmem:[%s6553_s1] sm:$0xff]  ;;  %v59_v37 = vld [vmem:[%s6552_s0 + $0x31] sm:$0xff]  ;;  %v62_v44 = vld [vmem:[%s6552_s0 + $0x49] sm:$0xff] }
   0xc   :  { %3791 = vmatmul.mubr.msk.f32.gmra.mrb[2].mxu0 %vm71_vm0, %v461_v12  ;;  %v4045_v36 = vpack.c.bf16 %v52_v34, %v51_v33  ;;  %v690_v38 = vld [vmem:[%s6552_s0 + $0x2b] sm:$0xff]  ;;  %v691_v39 = vld [vmem:[%s6552_s0 + $0x33] sm:$0xff]  ;;  %v61_v41 = vld [vmem:[%s6552_s0 + $0x41] sm:$0xff] }
   0xd   :  { %3793 = vmatprep.mubr.msk.f32.mxu0 %vm71_vm0, %v462_v13  ;;  %v60_v40 = vld [vmem:[%s6552_s0 + $0x39] sm:$0xff]  ;;  %v693_v43 = vld [vmem:[%s6552_s0 + $0x43] sm:$0xff]  ;;  %v63_v45 = vld [vmem:[%s6552_s0 + $0x51] sm:$0xff] }
   0xe   :  { %3732 = vmatmul.mubr.msk.f32.vlgmr.msra.gmra.mrb[0].mxu1 %vm71_vm0, %v54_v22  ;;  %4046 = vmatprep.subr.bf16.mxu1 %v4045_v36  ;;  %v692_v42 = vld [vmem:[%s6552_s0 + $0x3b] sm:$0xff]  ;;  %v694_v46 = vld [vmem:[%s6552_s0 + $0x4b] sm:$0xff]  ;;  %v695_v47 = vld [vmem:[%s6552_s0 + $0x53] sm:$0xff] }
   0xf   :  { %3734 = vmatprep.mubr.msk.f32.mxu1 %vm71_vm0, %v55_v25  ;;  %4048 = vmatpush3.bf16.msra.mxu1 %v4045_v36  ;;  %v64_v48 = vld [vmem:[%s6552_s0 + $0x59] sm:$0xff]  ;;  %v65_v49 = vld [vmem:[%s6552_s0 + $0x61] sm:$0xff]  ;;  %v66_v52 = vld [vmem:[%s6552_s0 + $0x69] sm:$0xff] }
  0x10   :  { %3794 = vmatmul.mubr.msk.f32.gmra.mrb[4].mxu0 %vm71_vm0, %v463_v14  ;;  %4089 = vmatprep.subr.bf16.mxu1 %v4373_v3  ;;  %v696_v50 = vld [vmem:[%s6552_s0 + $0x5b] sm:$0xff]  ;;  %v697_v51 = vld [vmem:[%s6552_s0 + $0x63] sm:$0xff]  ;;  %v67_v53 = vld [vmem:[%s6552_s0 + $0x71] sm:$0xff] }
  0x11   :  { %3796 = vmatprep.mubr.msk.f32.mxu0 %vm71_vm0, %v464_v15  ;;  %v698_v54 = vld [vmem:[%s6552_s0 + $0x6b] sm:$0xff]  ;;  %v699_v55 = vld [vmem:[%s6552_s0 + $0x73] sm:$0xff]  ;;  %v35_v57 = vld [vmem:[%s6552_s0] sm:$0xff] }
  0x12   :  { %3735 = vmatmul.mubr.msk.f32.gmra.mrb[2].mxu1 %vm71_vm0, %v56_v29  ;;  %v68_v56 = vld [vmem:[%s6552_s0 + $0x79] sm:$0xff] }
  0x13   :  { %3737 = vmatprep.mubr.msk.f32.mxu1 %vm71_vm0, %v57_v30 }
  0x14   :  { %3797 = vmatmul.mubr.msk.f32.gmra.mrb[6].mxu0 %vm71_vm0, %v465_v20 }
  0x15   :  { %3815 = vmatprep.mubr.msk.f32.mxu0 %vm71_vm0, %v685_v21 }
  0x16   :  { %3738 = vmatmul.mubr.msk.f32.gmra.mrb[4].mxu1 %vm71_vm0, %v58_v35 }
  0x17   :  { %3740 = vmatprep.mubr.msk.f32.mxu1 %vm71_vm0, %v59_v37 }
  0x18   :  { %3816 = vmatmul.mubr.msk.f32.vlgmr.msra.gmra.mrb[0].mxu0 %vm71_vm0, %v686_v26 }
  0x19   :  { %4060 = vmatpush3.bf16.msra.mxu0 %v4057_v11  ;;  %3818 = vmatprep.mubr.msk.f32.mxu0 %vm71_vm0, %v687_v27 }
  0x1a   :  { %4062 = vmatprep.subr.bf16.mxu0 %v4451_v28  ;;  %3741 = vmatmul.mubr.msk.f32.gmra.mrb[6].mxu1 %vm71_vm0, %v60_v40 }
  0x1b   :  { %3743 = vmatprep.mubr.msk.f32.mxu1 %vm71_vm0, %v61_v41 }
  0x1c   :  { %3819 = vmatmul.mubr.msk.f32.gmra.mrb[2].mxu0 %vm71_vm0, %v688_v31 }
  0x1d   :  { %3821 = vmatprep.mubr.msk.f32.mxu0 %vm71_vm0, %v689_v32 }
  0x1e   :  { %3744 = vmatmul.mubr.msk.f32.gmra.mrb[8].mxu1 %vm71_vm0, %v62_v44 }
  0x1f   :  { %3746 = vmatprep.mubr.msk.f32.mxu1 %vm71_vm0, %v63_v45 }
  0x20   :  { %3822 = vmatmul.mubr.msk.f32.gmra.mrb[4].mxu0 %vm71_vm0, %v690_v38 }
  0x21   :  { %3824 = vmatprep.mubr.msk.f32.mxu0 %vm71_vm0, %v691_v39 }
  0x22   :  { %3747 = vmatmul.mubr.msk.f32.gmra.mrb[10].mxu1 %vm71_vm0, %v64_v48 }
  0x23   :  { %3749 = vmatprep.mubr.msk.f32.mxu1 %vm71_vm0, %v65_v49 }
  0x24   :  { %3825 = vmatmul.mubr.msk.f32.gmra.mrb[6].mxu0 %vm71_vm0, %v692_v42 }
  0x25   :  { %3827 = vmatprep.mubr.msk.f32.mxu0 %vm71_vm0, %v693_v43 }
  0x26   :  { %3750 = vmatmul.mubr.msk.f32.gmra.mrb[12].mxu1 %vm71_vm0, %v66_v52 }
  0x27   :  { %3752 = vmatprep.mubr.msk.f32.mxu1 %vm71_vm0, %v67_v53 }
  0x28   :  { %3828 = vmatmul.mubr.msk.f32.gmra.mrb[8].mxu0 %vm71_vm0, %v694_v46 }
  0x29   :  { %3830 = vmatprep.mubr.msk.f32.mxu0 %vm71_vm0, %v695_v47 }
  0x2c   :  { %3831 = vmatmul.mubr.msk.f32.gmra.mrb[10].mxu0 %vm71_vm0, %v696_v50 }
  0x2d   :  { %3833 = vmatprep.mubr.msk.f32.mxu0 %vm71_vm0, %v697_v51 }
  0x30   :  { %3834 = vmatmul.mubr.msk.f32.gmra.mrb[12].mxu0 %vm71_vm0, %v698_v54 }
  0x31   :  { %16 = vsyncpa [#allocation3], 0  ;;  %3836 = vmatprep.mubr.msk.f32.mxu0 %vm71_vm0, %v699_v55  ;;  %v700_v58 = vld [vmem:[%s6552_s0 + $0x7b] sm:$0xff]  ;;  %v912_v59 = vld [vmem:[%s6552_s0 + $0x4] sm:$0xff]  ;;  %3753 = vmatmul.mubr.msk.f32.gmra.mrb[14].mxu1 %vm71_vm0, %v68_v56  ;;  %vm1870_vm1 = vcmask 261120   ;;  %vm2080_vm2 = vcmask 64512  }
  0x32   :  { %v1382_v60 = vld [vmem:[%s6553_s1 + $0x60] sm:$0xff]  ;;  %v1383_v61 = vld [vmem:[%s6553_s1 + $0x68] sm:$0xff]  ;;  %3759 = vmatprep.mubr.msk.f32.mxu1 %vm71_vm0, %v35_v57  ;;  %v37_v63 = vld [vmem:[%s6552_s0 + $0x10] sm:$0xff]  ;;  %vm2151_vm3 = vcmask 0   ;;  %vm2590_vm4 = vcmask 129024   ;;  %s4302_s26 = smov 96  }
  0x33   :  { %v36_v62 = vld [vmem:[%s6552_s0 + $0x8] sm:$0xff]  ;;  %v914_v1 = vld [vmem:[%s6552_s0 + $0x14] sm:$0xff]  ;;  %v4594_v2 = vpack.c.bf16 %v1383_v61, %v1382_v60  ;;  %v39_v5 = vld [vmem:[%s6552_s0 + $0x20] sm:$0xff]  ;;  %s4303_s13 = smov 80   ;;  %s4304_s21 = smov 64  }
  0x34   :  { %3837 = vmatmul.mubr.msk.f32.gmra.mrb[14].mxu0 %vm71_vm0, %v700_v58  ;;  %v913_v0 = vld [vmem:[%s6552_s0 + $0xc] sm:$0xff]  ;;  %v38_v4 = vld [vmem:[%s6552_s0 + $0x18] sm:$0xff]  ;;  %v916_v7 = vld [vmem:[%s6552_s0 + $0x24] sm:$0xff]  ;;  %s4305_s25 = smov 48   ;;  %s4306_s14 = smov 32  }
  0x35   :  { %3843 = vmatprep.mubr.msk.f32.mxu0 %vm71_vm0, %v912_v59  ;;  %3760 = vmatmul.mubr.msk.f32.vlgmr.msra.gmra.mrb[0].mxu1 %vm71_vm0, %v36_v62  ;;  %v915_v6 = vld [vmem:[%s6552_s0 + $0x1c] sm:$0xff]  ;;  %v41_v8 = vld [vmem:[%s6552_s0 + $0x30] sm:$0xff]  ;;  %v920_v14 = vld [vmem:[%s6552_s0 + $0x44] sm:$0xff]  ;;  %s4308_s19 = smov [#allocation2]  }
  0x36   :  { %3762 = vmatprep.mubr.msk.f32.mxu1 %vm71_vm0, %v37_v63  ;;  %4090 = vmatpush3.bf16.msra.mxu1 %v4373_v3  ;;  %v40_v3 = vld [vmem:[%s6552_s0 + $0x28] sm:$0xff]  ;;  %v918_v10 = vld [vmem:[%s6552_s0 + $0x34] sm:$0xff]  ;;  %v43_v12 = vld [vmem:[%s6552_s0 + $0x40] sm:$0xff] }
  0x37   :  { %v917_v9 = vld [vmem:[%s6552_s0 + $0x2c] sm:$0xff]  ;;  %v42_v11 = vld [vmem:[%s6552_s0 + $0x38] sm:$0xff]  ;;  %v47_v20 = vld [vmem:[%s6552_s0 + $0x60] sm:$0xff] }
  0x38   :  { %3844 = vmatmul.mubr.msk.f32.vlgmr.msra.gmra.mrb[0].mxu0 %vm71_vm0, %v913_v0  ;;  %v919_v13 = vld [vmem:[%s6552_s0 + $0x3c] sm:$0xff]  ;;  %v44_v15 = vld [vmem:[%s6552_s0 + $0x48] sm:$0xff]  ;;  %v45_v16 = vld [vmem:[%s6552_s0 + $0x50] sm:$0xff] }
  0x39   :  { %4064 = vmatpush3.bf16.msra.mxu0 %v4451_v28  ;;  %3846 = vmatprep.mubr.msk.f32.mxu0 %vm71_vm0, %v914_v1  ;;  %v921_v17 = vld [vmem:[%s6552_s0 + $0x4c] sm:$0xff]  ;;  %v922_v18 = vld [vmem:[%s6552_s0 + $0x54] sm:$0xff]  ;;  %v923_v21 = vld [vmem:[%s6552_s0 + $0x5c] sm:$0xff] }
  0x3a   :  { %4066 = vmatprep.subr.bf16.mxu0 %v4594_v2  ;;  %3763 = vmatmul.mubr.msk.f32.gmra.mrb[2].mxu1 %vm71_vm0, %v38_v4  ;;  %v46_v19 = vld [vmem:[%s6552_s0 + $0x58] sm:$0xff]  ;;  %v924_v22 = vld [vmem:[%s6552_s0 + $0x64] sm:$0xff]  ;;  %v49_v24 = vld [vmem:[%s6552_s0 + $0x70] sm:$0xff] }
  0x3b   :  { %3765 = vmatprep.mubr.msk.f32.mxu1 %vm71_vm0, %v39_v5  ;;  %v48_v23 = vld [vmem:[%s6552_s0 + $0x68] sm:$0xff]  ;;  %v926_v26 = vld [vmem:[%s6552_s0 + $0x74] sm:$0xff]  ;;  %v927_v29 = vld [vmem:[%s6552_s0 + $0x7c] sm:$0xff] }
  0x3c   :  { %3847 = vmatmul.mubr.msk.f32.gmra.mrb[2].mxu0 %vm71_vm0, %v915_v6  ;;  %v925_v25 = vld [vmem:[%s6552_s0 + $0x6c] sm:$0xff]  ;;  %v50_v27 = vld [vmem:[%s6552_s0 + $0x78] sm:$0xff]  ;;  %v466_v28 = vld [vmem:[%s6552_s0 + $0x42] sm:$0xff] }
  0x3d   :  { %3849 = vmatprep.mubr.msk.f32.mxu0 %vm71_vm0, %v916_v7  ;;  %v1139_v30 = vld [vmem:[%s6552_s0 + $0x5] sm:$0xff]  ;;  %v1609_v31 = vld [vmem:[%s6553_s1 + $0x70] sm:$0xff]  ;;  %v1610_v32 = vld [vmem:[%s6553_s1 + $0x78] sm:$0xff] }
  0x3e   :  { %3766 = vmatmul.mubr.msk.f32.gmra.mrb[4].mxu1 %vm71_vm0, %v40_v3  ;;  %v467_v33 = vld [vmem:[%s6552_s0 + $0x4a] sm:$0xff]  ;;  %v468_v34 = vld [vmem:[%s6552_s0 + $0x52] sm:$0xff]  ;;  %v4069_v37 = vpack.c.bf16 %v1610_v32, %v1609_v31  ;;  %v469_v38 = vld [vmem:[%s6552_s0 + $0x5a] sm:$0xff] }
  0x3f   :  { %3768 = vmatprep.mubr.msk.f32.mxu1 %vm71_vm0, %v41_v8  ;;  %v1140_v35 = vld [vmem:[%s6552_s0 + $0xd] sm:$0xff]  ;;  %v1141_v36 = vld [vmem:[%s6552_s0 + $0x15] sm:$0xff]  ;;  %v470_v39 = vld [vmem:[%s6552_s0 + $0x62] sm:$0xff] }
  0x40   :  { %3850 = vmatmul.mubr.msk.f32.gmra.mrb[4].mxu0 %vm71_vm0, %v917_v9  ;;  %v1142_v40 = vld [vmem:[%s6552_s0 + $0x1d] sm:$0xff]  ;;  %v1143_v41 = vld [vmem:[%s6552_s0 + $0x25] sm:$0xff]  ;;  %v472_v43 = vld [vmem:[%s6552_s0 + $0x72] sm:$0xff] }
  0x41   :  { %3852 = vmatprep.mubr.msk.f32.mxu0 %vm71_vm0, %v918_v10  ;;  %v471_v42 = vld [vmem:[%s6552_s0 + $0x6a] sm:$0xff]  ;;  %v1145_v45 = vld [vmem:[%s6552_s0 + $0x35] sm:$0xff]  ;;  %v1146_v47 = vld [vmem:[%s6552_s0 + $0x3d] sm:$0xff] }
  0x42   :  { %3769 = vmatmul.mubr.msk.f32.gmra.mrb[6].mxu1 %vm71_vm0, %v42_v11  ;;  %v1144_v44 = vld [vmem:[%s6552_s0 + $0x2d] sm:$0xff]  ;;  %v473_v46 = vld [vmem:[%s6552_s0 + $0x7a] sm:$0xff]  ;;  %v1147_v48 = vld [vmem:[%s6552_s0 + $0x45] sm:$0xff] }
  0x43   :  { %3771 = vmatprep.mubr.msk.f32.mxu1 %vm71_vm0, %v43_v12  ;;  %v1148_v49 = vld [vmem:[%s6552_s0 + $0x4d] sm:$0xff]  ;;  %v1149_v50 = vld [vmem:[%s6552_s0 + $0x55] sm:$0xff]  ;;  %v1150_v51 = vld [vmem:[%s6552_s0 + $0x5d] sm:$0xff] }
  0x44   :  { %3853 = vmatmul.mubr.msk.f32.gmra.mrb[6].mxu0 %vm71_vm0, %v919_v13  ;;  %v1151_v52 = vld [vmem:[%s6552_s0 + $0x65] sm:$0xff]  ;;  %v1152_v53 = vld [vmem:[%s6552_s0 + $0x6d] sm:$0xff]  ;;  %v1153_v54 = vld [vmem:[%s6552_s0 + $0x75] sm:$0xff] }
  0x45   :  { %3855 = vmatprep.mubr.msk.f32.mxu0 %vm71_vm0, %v920_v14  ;;  %v1154_v55 = vld [vmem:[%s6552_s0 + $0x7d] sm:$0xff]  ;;  %v1366_v56 = vld [vmem:[%s6552_s0 + $0x6] sm:$0xff]  ;;  %v1367_v57 = vld [vmem:[%s6552_s0 + $0xe] sm:$0xff] }
  0x46   :  { %3772 = vmatmul.mubr.msk.f32.gmra.mrb[8].mxu1 %vm71_vm0, %v44_v15  ;;  %v1368_v58 = vld [vmem:[%s6552_s0 + $0x16] sm:$0xff]  ;;  %v1369_v59 = vld [vmem:[%s6552_s0 + $0x1e] sm:$0xff]  ;;  %v1370_v60 = vld [vmem:[%s6552_s0 + $0x26] sm:$0xff] }
  0x47   :  { %3774 = vmatprep.mubr.msk.f32.mxu1 %vm71_vm0, %v45_v16  ;;  %v1371_v61 = vld [vmem:[%s6552_s0 + $0x2e] sm:$0xff]  ;;  %v1372_v62 = vld [vmem:[%s6552_s0 + $0x36] sm:$0xff]  ;;  %v1373_v63 = vld [vmem:[%s6552_s0 + $0x3e] sm:$0xff] }
  0x48   :  { %3856 = vmatmul.mubr.msk.f32.gmra.mrb[8].mxu0 %vm71_vm0, %v921_v17  ;;  %v1374_v0 = vld [vmem:[%s6552_s0 + $0x46] sm:$0xff]  ;;  %v1375_v1 = vld [vmem:[%s6552_s0 + $0x4e] sm:$0xff]  ;;  %v1377_v4 = vld [vmem:[%s6552_s0 + $0x5e] sm:$0xff] }
  0x49   :  { %3858 = vmatprep.mubr.msk.f32.mxu0 %vm71_vm0, %v922_v18  ;;  %v1378_v5 = vld [vmem:[%s6552_s0 + $0x66] sm:$0xff]  ;;  %v1379_v6 = vld [vmem:[%s6552_s0 + $0x6e] sm:$0xff]  ;;  %v1380_v7 = vld [vmem:[%s6552_s0 + $0x76] sm:$0xff] }
  0x4a   :  { %3775 = vmatmul.mubr.msk.f32.gmra.mrb[10].mxu1 %vm71_vm0, %v46_v19  ;;  %v1381_v3 = vld [vmem:[%s6552_s0 + $0x7e] sm:$0xff]  ;;  %v1593_v8 = vld [vmem:[%s6552_s0 + $0x7] sm:$0xff]  ;;  %v1594_v9 = vld [vmem:[%s6552_s0 + $0xf] sm:$0xff] }
  0x4b   :  { %3777 = vmatprep.mubr.msk.f32.mxu1 %vm71_vm0, %v47_v20  ;;  %v1595_v10 = vld [vmem:[%s6552_s0 + $0x17] sm:$0xff]  ;;  %v1596_v11 = vld [vmem:[%s6552_s0 + $0x1f] sm:$0xff]  ;;  %v1597_v12 = vld [vmem:[%s6552_s0 + $0x27] sm:$0xff] }
  0x4c   :  { %3859 = vmatmul.mubr.msk.f32.gmra.mrb[10].mxu0 %vm71_vm0, %v923_v21  ;;  %v1598_v13 = vld [vmem:[%s6552_s0 + $0x2f] sm:$0xff]  ;;  %v1599_v14 = vld [vmem:[%s6552_s0 + $0x37] sm:$0xff]  ;;  %v1600_v15 = vld [vmem:[%s6552_s0 + $0x3f] sm:$0xff] }
  0x4d   :  { %3861 = vmatprep.mubr.msk.f32.mxu0 %vm71_vm0, %v924_v22  ;;  %v1601_v16 = vld [vmem:[%s6552_s0 + $0x47] sm:$0xff]  ;;  %v1602_v17 = vld [vmem:[%s6552_s0 + $0x4f] sm:$0xff]  ;;  %v1603_v18 = vld [vmem:[%s6552_s0 + $0x57] sm:$0xff] }
  0x4e   :  { %3778 = vmatmul.mubr.msk.f32.gmra.mrb[12].mxu1 %vm71_vm0, %v48_v23  ;;  %v1604_v19 = vld [vmem:[%s6552_s0 + $0x5f] sm:$0xff]  ;;  %v1605_v20 = vld [vmem:[%s6552_s0 + $0x67] sm:$0xff]  ;;  %v1606_v21 = vld [vmem:[%s6552_s0 + $0x6f] sm:$0xff] }
  0x4f   :  { %3780 = vmatprep.mubr.msk.f32.mxu1 %vm71_vm0, %v49_v24  ;;  %v1607_v22 = vld [vmem:[%s6552_s0 + $0x77] sm:$0xff]  ;;  %v1608_v23 = vld [vmem:[%s6552_s0 + $0x7f] sm:$0xff] }
  0x50   :  { %3862 = vmatmul.mubr.msk.f32.gmra.mrb[12].mxu0 %vm71_vm0, %v925_v25  ;;  %v1859_v24 = vld [vmem:[%s6555_s3] sm:$0xff]  ;;  %v1860_v25 = vld [vmem:[%s6555_s3 + $0x8] sm:$0xff] }
  0x51   :  { %3864 = vmatprep.mubr.msk.f32.mxu0 %vm71_vm0, %v926_v26  ;;  %v4073_v26 = vpack.c.bf16 %v1860_v25, %v1859_v24 }
  0x52   :  { %3781 = vmatmul.mubr.msk.f32.gmra.mrb[14].mxu1 %vm71_vm0, %v50_v27  ;;  %v1861_v27 = vld [vmem:[%s6555_s3 + $0x10] sm:$0xff] }
  0x53   :  { %3799 = vmatprep.mubr.msk.f32.mxu1 %vm71_vm0, %v466_v28  ;;  %4074 = vmatprep.subr.bf16.mxu1 %v4073_v26  ;;  %v1862_v28 = vld [vmem:[%s6555_s3 + $0x18] sm:$0xff] }
  0x54   :  { %3865 = vmatmul.mubr.msk.f32.gmra.mrb[14].mxu0 %vm71_vm0, %v927_v29  ;;  %v4077_v29 = vpack.c.bf16 %v1862_v28, %v1861_v27 }
  0x55   :  { %3871 = vmatprep.mubr.msk.f32.mxu0 %vm71_vm0, %v1139_v30 }
  0x56   :  { %3800 = vmatmul.mubr.msk.f32.vlgmr.msra.gmra.mrb[8].mxu1 %vm71_vm0, %v467_v33 }
  0x57   :  { %3802 = vmatprep.mubr.msk.f32.mxu1 %vm71_vm0, %v468_v34  ;;  %4076 = vmatpush3.bf16.msra.mxu1 %v4073_v26 }
  0x58   :  { %3872 = vmatmul.mubr.msk.f32.vlgmr.msra.gmra.mrb[0].mxu0 %vm71_vm0, %v1140_v35  ;;  %4078 = vmatprep.subr.bf16.mxu1 %v4077_v29 }
  0x59   :  { %4068 = vmatpush3.bf16.msra.mxu0 %v4594_v2  ;;  %3874 = vmatprep.mubr.msk.f32.mxu0 %vm71_vm0, %v1141_v36  ;;  %v1376_v2 = vld [vmem:[%s6552_s0 + $0x56] sm:$0xff]  ;;  %s4301_s0 = smov 112  }
  0x5a   :  { %4070 = vmatprep.subr.bf16.mxu0 %v4069_v37  ;;  %3803 = vmatmul.mubr.msk.f32.gmra.mrb[10].mxu1 %vm71_vm0, %v469_v38  ;;  %v2153_v38 = vld [vmem:[%s6557_s5] sm:$0xff] }
  0x5b   :  { %3805 = vmatprep.mubr.msk.f32.mxu1 %vm71_vm0, %v470_v39  ;;  %4080 = vmatpush3.bf16.msra.mxu1 %v4077_v29 }
  0x5c   :  { %3875 = vmatmul.mubr.msk.f32.gmra.mrb[2].mxu0 %vm71_vm0, %v1142_v40  ;;  %3983 = vmatprep.subr.mxu1 %v2153_v38 }
  0x5d   :  { %3877 = vmatprep.mubr.msk.f32.mxu0 %vm71_vm0, %v1143_v41 }
  0x5e   :  { %3806 = vmatmul.mubr.msk.f32.gmra.mrb[12].mxu1 %vm71_vm0, %v471_v42 }
  0x5f   :  { %3808 = vmatprep.mubr.msk.f32.mxu1 %vm71_vm0, %v472_v43 }
  0x60   :  { %3878 = vmatmul.mubr.msk.f32.gmra.mrb[4].mxu0 %vm71_vm0, %v1144_v44 }
  0x61   :  { %3880 = vmatprep.mubr.msk.f32.mxu0 %vm71_vm0, %v1145_v45 }
  0x62   :  { %3809 = vmatmul.mubr.msk.f32.gmra.mrb[14].mxu1 %vm71_vm0, %v473_v46 }
  0x64   :  { %3881 = vmatmul.mubr.msk.f32.gmra.mrb[6].mxu0 %vm71_vm0, %v1146_v47 }
  0x65   :  { %3883 = vmatprep.mubr.msk.f32.mxu0 %vm71_vm0, %v1147_v48  ;;  %v4964_v48 = vld [vmem:[%s6554_s2] ss:$0 sm:$0xff] }
  0x68   :  { %3884 = vmatmul.mubr.msk.f32.gmra.mrb[8].mxu0 %vm71_vm0, %v1148_v49 }
  0x69   :  { %3886 = vmatprep.mubr.msk.f32.mxu0 %vm71_vm0, %v1149_v50 }
  0x6c   :  { %3887 = vmatmul.mubr.msk.f32.gmra.mrb[10].mxu0 %vm71_vm0, %v1150_v51 }
  0x6d   :  { %3889 = vmatprep.mubr.msk.f32.mxu0 %vm71_vm0, %v1151_v52 }
  0x70   :  { %3890 = vmatmul.mubr.msk.f32.gmra.mrb[12].mxu0 %vm71_vm0, %v1152_v53 }
  0x71   :  { %3892 = vmatprep.mubr.msk.f32.mxu0 %vm71_vm0, %v1153_v54 }
  0x74   :  { %3893 = vmatmul.mubr.msk.f32.gmra.mrb[14].mxu0 %vm71_vm0, %v1154_v55 }
  0x75   :  { %3899 = vmatprep.mubr.msk.f32.mxu0 %vm71_vm0, %v1366_v56 }
  0x78   :  { %3900 = vmatmul.mubr.msk.f32.vlgmr.msra.gmra.mrb[0].mxu0 %vm71_vm0, %v1367_v57 }
  0x79   :  { %4072 = vmatpush3.bf16.msra.mxu0 %v4069_v37  ;;  %3902 = vmatprep.mubr.msk.f32.mxu0 %vm71_vm0, %v1368_v58 }
  0x7c   :  { %3903 = vmatmul.mubr.msk.f32.gmra.mrb[2].mxu0 %vm71_vm0, %v1369_v59 }
  0x7d   :  { %3905 = vmatprep.mubr.msk.f32.mxu0 %vm71_vm0, %v1370_v60 }
  0x80   :  { %3906 = vmatmul.mubr.msk.f32.gmra.mrb[4].mxu0 %vm71_vm0, %v1371_v61 }
  0x81   :  { %3908 = vmatprep.mubr.msk.f32.mxu0 %vm71_vm0, %v1372_v62 }
  0x84   :  { %3909 = vmatmul.mubr.msk.f32.gmra.mrb[6].mxu0 %vm71_vm0, %v1373_v63 }
  0x85   :  { %3911 = vmatprep.mubr.msk.f32.mxu0 %vm71_vm0, %v1374_v0 }
  0x88   :  { %3912 = vmatmul.mubr.msk.f32.gmra.mrb[8].mxu0 %vm71_vm0, %v1375_v1 }
  0x89   :  { %3914 = vmatprep.mubr.msk.f32.mxu0 %vm71_vm0, %v1376_v2 }
  0x8c   :  { %3915 = vmatmul.mubr.msk.f32.gmra.mrb[10].mxu0 %vm71_vm0, %v1377_v4 }
  0x8d   :  { %3917 = vmatprep.mubr.msk.f32.mxu0 %vm71_vm0, %v1378_v5 }
  0x90   :  { %3918 = vmatmul.mubr.msk.f32.gmra.mrb[12].mxu0 %vm71_vm0, %v1379_v6 }
  0x91   :  { %3920 = vmatprep.mubr.msk.f32.mxu0 %vm71_vm0, %v1380_v7 }
  0x94   :  { %3921 = vmatmul.mubr.msk.f32.gmra.mrb[14].mxu0 %vm71_vm0, %v1381_v3 }
  0x95   :  { %3927 = vmatprep.mubr.msk.f32.mxu0 %vm71_vm0, %v1593_v8 }
  0x98   :  { %3928 = vmatmul.mubr.msk.f32.vlgmr.msra.gmra.mrb[0].mxu0 %vm71_vm0, %v1594_v9 }
  0x99   :  { %3930 = vmatprep.mubr.msk.f32.mxu0 %vm71_vm0, %v1595_v10 }
  0x9c   :  { %3931 = vmatmul.mubr.msk.f32.gmra.mrb[2].mxu0 %vm71_vm0, %v1596_v11 }
  0x9d   :  { %3933 = vmatprep.mubr.msk.f32.mxu0 %vm71_vm0, %v1597_v12 }
  0xa0   :  { %3934 = vmatmul.mubr.msk.f32.gmra.mrb[4].mxu0 %vm71_vm0, %v1598_v13 }
  0xa1   :  { %3936 = vmatprep.mubr.msk.f32.mxu0 %vm71_vm0, %v1599_v14 }
  0xa4   :  { %3937 = vmatmul.mubr.msk.f32.gmra.mrb[6].mxu0 %vm71_vm0, %v1600_v15 }
  0xa5   :  { %3939 = vmatprep.mubr.msk.f32.mxu0 %vm71_vm0, %v1601_v16 }
  0xa8   :  { %3940 = vmatmul.mubr.msk.f32.gmra.mrb[8].mxu0 %vm71_vm0, %v1602_v17 }
  0xa9   :  { %3942 = vmatprep.mubr.msk.f32.mxu0 %vm71_vm0, %v1603_v18 }
  0xac   :  { %3943 = vmatmul.mubr.msk.f32.gmra.mrb[10].mxu0 %vm71_vm0, %v1604_v19 }
  0xad   :  { %3945 = vmatprep.mubr.msk.f32.mxu0 %vm71_vm0, %v1605_v20 }
  0xb0   :  { %3946 = vmatmul.mubr.msk.f32.gmra.mrb[12].mxu0 %vm71_vm0, %v1606_v21 }
  0xb1   :  { %3948 = vmatprep.mubr.msk.f32.mxu0 %vm71_vm0, %v1607_v22 }
  0xb4   :  { %3949 = vmatmul.mubr.msk.f32.gmra.mrb[14].mxu0 %vm71_vm0, %v1608_v23 }
 0x108   :  { %v3761_v30 = vpop.f32.mrb[0].mxu1 }
 0x109   :  { %v379_v31 = vpop.f32.mrb[1].mxu1 }
 0x10d   :  { %v3764_v32 = vpop.f32.mrb[2].mxu1 }
 0x10e   :  { %v389_v33 = vpop.f32.mrb[3].mxu1 }
 0x111   :  { %v3767_v34 = vpop.f32.mrb[4].mxu1 }
 0x112   :  { %v399_v35 = vpop.f32.mrb[5].mxu1 }
 0x115   :  { %v3770_v36 = vpop.f32.mrb[6].mxu1 }
 0x116   :  { %v409_v37 = vpop.f32.mrb[7].mxu1 }
 0x129   :  { %v3801_v39 = vpop.f32.mrb[8].mxu1 }
 0x12a   :  { %v630_v40 = vpop.f32.mrb[9].mxu1 }
 0x12d   :  { %v3804_v41 = vpop.f32.mrb[10].mxu1 }
 0x12e   :  { %v640_v42 = vpop.f32.mrb[11].mxu1 }
 0x131   :  { %v4953_v43 = vpop.f32.mrb[12].mxu1 }
 0x132   :  { %v4955_v44 = vpop.f32.mrb[13].mxu1 }
 0x135   :  { %v4957_v45 = vpop.f32.mrb[14].mxu1 }
 0x136   :  { %v4959_v46 = vpop.f32.mrb[15].mxu1 }
 0x16b   :  { %v3929_v47 = vpop.f32.mrb[0].mxu0 }
 0x16c   :  { %v4091_v49 = vadd.f32 %v3929_v47, %v3761_v30  ;;  %v1725_v50 = vpop.f32.mrb[1].mxu0 }
 0x16d   :  { %v4092_v51 = vadd.f32 %v1725_v50, %v379_v31 }
 0x16e   :  { %v1828_v52 = vadd.f32 %v4091_v49, %v4964_v48 }
 0x16f   :  { %v1827_v53 = vadd.f32 %v4092_v51, %v4964_v48  ;;  %v3932_v54 = vpop.f32.mrb[2].mxu0 }
 0x170   :  { %v4093_v55 = vadd.f32 %v3932_v54, %v3764_v32  ;;  %v1735_v56 = vpop.f32.mrb[3].mxu0 }
 0x171   :  { %4212 = vtanh.f32 %v1827_v53  ;;  %v4094_v57 = vadd.f32 %v1735_v56, %v389_v33 }
 0x172   :  { %4214 = vtanh.f32 %v1828_v52  ;;  %v1830_v58 = vadd.f32 %v4093_v55, %v4964_v48 }
 0x173   :  { %v1829_v59 = vadd.f32 %v4094_v57, %v4964_v48  ;;  %v3935_v60 = vpop.f32.mrb[4].mxu0 }
 0x174   :  { %v4095_v61 = vadd.f32 %v3935_v60, %v3767_v34  ;;  %v1745_v62 = vpop.f32.mrb[5].mxu0 }
 0x175   :  { %4216 = vtanh.f32 %v1829_v59  ;;  %v4096_v63 = vadd.f32 %v1745_v62, %v399_v35 }
 0x176   :  { %4218 = vtanh.f32 %v1830_v58  ;;  %v1832_v0 = vadd.f32 %v4095_v61, %v4964_v48 }
 0x177   :  { %v1831_v1 = vadd.f32 %v4096_v63, %v4964_v48  ;;  %v3938_v2 = vpop.f32.mrb[6].mxu0 }
 0x178   :  { %v4097_v4 = vadd.f32 %v3938_v2, %v3770_v36  ;;  %v1755_v5 = vpop.f32.mrb[7].mxu0 }
 0x179   :  { %4220 = vtanh.f32 %v1831_v1  ;;  %v4098_v6 = vadd.f32 %v1755_v5, %v409_v37 }
 0x17a   :  { %4222 = vtanh.f32 %v1832_v0  ;;  %v1834_v7 = vadd.f32 %v4097_v4, %v4964_v48 }
 0x17b   :  { %v4213_v3 = vpop.eup %4212  ;;  %v1833_v8 = vadd.f32 %v4098_v6, %v4964_v48  ;;  %v3941_v9 = vpop.f32.mrb[8].mxu0 }
 0x17c   :  { %v4215_v10 = vpop.eup %4214  ;;  %v4099_v11 = vadd.f32 %v3941_v9, %v3801_v39  ;;  %v1765_v12 = vpop.f32.mrb[9].mxu0  ;;  %3959 = vmatprep.mubr.msk.f32.mxu1 %vm1870_vm1, %v4213_v3 }
 0x17d   :  { %4224 = vtanh.f32 %v1833_v8  ;;  %v4100_v13 = vadd.f32 %v1765_v12, %v630_v40  ;;  %3960 = vmatmul.mubr.msk.f32.vlgmr.msra.gmra.mrb[16].mxu1 %vm1870_vm1, %v4215_v10 }
 0x17e   :  { %4226 = vtanh.f32 %v1834_v7  ;;  %v1836_v14 = vadd.f32 %v4099_v11, %v4964_v48  ;;  %3984 = vmatpush3.msra.mxu1 %v2153_v38 }
 0x17f   :  { %v4217_v15 = vpop.eup %4216  ;;  %v1835_v16 = vadd.f32 %v4100_v13, %v4964_v48  ;;  %v3944_v17 = vpop.f32.mrb[10].mxu0 }
 0x180   :  { %v4219_v18 = vpop.eup %4218  ;;  %v4101_v19 = vadd.f32 %v3944_v17, %v3804_v41  ;;  %v1775_v20 = vpop.f32.mrb[11].mxu0  ;;  %3962 = vmatprep.mubr.msk.f32.mxu1 %vm1870_vm1, %v4217_v15 }
 0x181   :  { %4228 = vtanh.f32 %v1835_v16  ;;  %v4102_v21 = vadd.f32 %v1775_v20, %v640_v42  ;;  %3963 = vmatmul.mubr.msk.f32.gmra.mrb[18].mxu1 %vm1870_vm1, %v4219_v18 }
 0x182   :  { %4230 = vtanh.f32 %v1836_v14  ;;  %v1838_v22 = vadd.f32 %v4101_v19, %v4964_v48 }
 0x183   :  { %v4221_v23 = vpop.eup %4220  ;;  %v1837_v24 = vadd.f32 %v4102_v21, %v4964_v48  ;;  %v3947_v25 = vpop.f32.mrb[12].mxu0 }
 0x184   :  { %v4223_v26 = vpop.eup %4222  ;;  %v4103_v27 = vadd.f32 %v3947_v25, %v4953_v43  ;;  %v1785_v28 = vpop.f32.mrb[13].mxu0  ;;  %3965 = vmatprep.mubr.msk.f32.mxu1 %vm1870_vm1, %v4221_v23 }
 0x185   :  { %4232 = vtanh.f32 %v1837_v24  ;;  %v4104_v29 = vadd.f32 %v1785_v28, %v4955_v44  ;;  %3966 = vmatmul.mubr.msk.f32.gmra.mrb[20].mxu1 %vm1870_vm1, %v4223_v26 }
 0x186   :  { %4234 = vtanh.f32 %v1838_v22  ;;  %v1840_v30 = vadd.f32 %v4103_v27, %v4964_v48 }
 0x187   :  { %v4225_v31 = vpop.eup %4224  ;;  %v1839_v32 = vadd.f32 %v4104_v29, %v4964_v48  ;;  %v3950_v33 = vpop.f32.mrb[14].mxu0 }
 0x188   :  { %v4227_v34 = vpop.eup %4226  ;;  %v4105_v35 = vadd.f32 %v3950_v33, %v4957_v45  ;;  %v1795_v36 = vpop.f32.mrb[15].mxu0  ;;  %3968 = vmatprep.mubr.msk.f32.mxu1 %vm1870_vm1, %v4225_v31 }
 0x189   :  { %4236 = vtanh.f32 %v1839_v32  ;;  %v4106_v37 = vadd.f32 %v1795_v36, %v4959_v46  ;;  %3969 = vmatmul.mubr.msk.f32.gmra.mrb[22].mxu1 %vm1870_vm1, %v4227_v34 }
 0x18a   :  { %4238 = vtanh.f32 %v1840_v30  ;;  %v1842_v38 = vadd.f32 %v4105_v35, %v4964_v48 }
 0x18b   :  { %v4229_v39 = vpop.eup %4228  ;;  %v1841_v40 = vadd.f32 %v4106_v37, %v4964_v48  ;;  %v5005_v48 = vld [vmem:[%s6556_s4] ss:$0 sm:$0xff] }
 0x18c   :  { %v4231_v41 = vpop.eup %4230  ;;  %3971 = vmatprep.mubr.msk.f32.mxu1 %vm1870_vm1, %v4229_v39 }
 0x18d   :  { %4240 = vtanh.f32 %v1841_v40  ;;  %3972 = vmatmul.mubr.msk.f32.gmra.mrb[24].mxu1 %vm1870_vm1, %v4231_v41 }
 0x18e   :  { %4242 = vtanh.f32 %v1842_v38 }
 0x18f   :  { %v4233_v42 = vpop.eup %4232 }
 0x190   :  { %v4235_v43 = vpop.eup %4234  ;;  %3974 = vmatprep.mubr.msk.f32.mxu1 %vm1870_vm1, %v4233_v42 }
 0x191   :  { %3975 = vmatmul.mubr.msk.f32.gmra.mrb[26].mxu1 %vm1870_vm1, %v4235_v43 }
 0x193   :  { %v4237_v44 = vpop.eup %4236 }
 0x194   :  { %v4239_v45 = vpop.eup %4238  ;;  %3977 = vmatprep.mubr.msk.f32.mxu1 %vm1870_vm1, %v4237_v44 }
 0x195   :  { %3978 = vmatmul.mubr.msk.f32.gmra.mrb[28].mxu1 %vm1870_vm1, %v4239_v45 }
 0x197   :  { %v4241_v46 = vpop.eup %4240 }
 0x198   :  { %v4243_v47 = vpop.eup %4242  ;;  %3980 = vmatprep.mubr.msk.f32.mxu1 %vm1870_vm1, %v4241_v46 }
 0x199   :  { %3981 = vmatmul.mubr.msk.f32.gmra.mrb[30].mxu1 %vm1870_vm1, %v4243_v47 }
 0x250   :  { %v3961_v49 = vpop.f32.mrb[16].mxu1 }
 0x251   :  { %v1991_v50 = vadd.f32 %v3961_v49, %v5005_v48  ;;  %v1985_v51 = vpop.f32.mrb[17].mxu1 }
 0x252   :  { %v1986_v52 = vadd.f32 %v5005_v48, %v1985_v51 }
 0x253   :  { %v2065_v53 = vmul.f32 %v1991_v50, %v1991_v50 }
 0x254   :  { %v3964_v54 = vpop.f32.mrb[18].mxu1  ;;  %3985 = vmatprep.mubr.msk.f32.mxu1 %vm2080_vm2, %v1986_v52  ;;  %v2064_v58 = vmul.f32 %v1986_v52, %v1986_v52  ;;  %v2372_v52 = vld [vmem:[%s6559_s7 + $0x10] sm:$0xff] }
 0x255   :  { %v2001_v55 = vadd.f32 %v3964_v54, %v5005_v48  ;;  %v1995_v56 = vpop.f32.mrb[19].mxu1  ;;  %3986 = vmatmul.mubr.msk.f32.vlgmr.msra.gmra.mrb[32].mxu1 %vm2080_vm2, %v1991_v50  ;;  %v2084_v57 = vsel %vm2080_vm2, %v2065_v53, 0.0  ;;  %v2371_v50 = vld [vmem:[%s6559_s7 + $0x8] sm:$0xff]  ;;  %v2373_v53 = vld [vmem:[%s6559_s7 + $0x18] sm:$0xff] }
 0x256   :  { %v1996_v59 = vadd.f32 %v5005_v48, %v1995_v56  ;;  %2085 = vadd.xlane.f32.xlu0 %v2084_v57  ;;  %v2081_v1 = vsel %vm2080_vm2, %v2064_v58, 0.0  ;;  %v4085_v54 = vpack.c.bf16 %v2373_v53, %v2372_v52 }
 0x257   :  { %v2067_v60 = vmul.f32 %v2001_v55, %v2001_v55 }
 0x258   :  { %v3967_v61 = vpop.f32.mrb[20].mxu1  ;;  %3988 = vmatprep.mubr.msk.f32.mxu1 %vm2080_vm2, %v1996_v59  ;;  %v2066_v2 = vmul.f32 %v1996_v59, %v1996_v59 }
 0x259   :  { %v2011_v62 = vadd.f32 %v3967_v61, %v5005_v48  ;;  %v2005_v63 = vpop.f32.mrb[21].mxu1  ;;  %3989 = vmatmul.mubr.msk.f32.gmra.mrb[34].mxu1 %vm2080_vm2, %v2001_v55  ;;  %v2090_v0 = vsel %vm2080_vm2, %v2067_v60, 0.0 }
 0x25a   :  { %v2006_v4 = vadd.f32 %v5005_v48, %v2005_v63  ;;  %2091 = vadd.xlane.f32.xlu1 %v2090_v0  ;;  %2082 = vadd.xlane.f32.xlu0 %v2081_v1  ;;  %v2087_v8 = vsel %vm2080_vm2, %v2066_v2, 0.0 }
 0x25b   :  { %v2069_v9 = vmul.f32 %v2011_v62, %v2011_v62 }
 0x25c   :  { %v3970_v5 = vpop.f32.mrb[22].mxu1  ;;  %3991 = vmatprep.mubr.msk.f32.mxu1 %vm2080_vm2, %v2006_v4  ;;  %v2068_v6 = vmul.f32 %v2006_v4, %v2006_v4 }
 0x25d   :  { %v2021_v7 = vadd.f32 %v3970_v5, %v5005_v48  ;;  %v2015_v3 = vpop.f32.mrb[23].mxu1  ;;  %3992 = vmatmul.mubr.msk.f32.gmra.mrb[36].mxu1 %vm2080_vm2, %v2011_v62  ;;  %v2096_v16 = vsel %vm2080_vm2, %v2069_v9, 0.0 }
 0x25e   :  { %v2016_v10 = vadd.f32 %v5005_v48, %v2015_v3  ;;  %2088 = vadd.xlane.f32.xlu1 %v2087_v8  ;;  %v2093_v11 = vsel %vm2080_vm2, %v2068_v6, 0.0 }
 0x25f   :  { %2094 = vadd.xlane.f32.xlu0 %v2093_v11  ;;  %v2071_v17 = vmul.f32 %v2021_v7, %v2021_v7 }
 0x260   :  { %v3973_v12 = vpop.f32.mrb[24].mxu1  ;;  %3994 = vmatprep.mubr.msk.f32.mxu1 %vm2080_vm2, %v2016_v10  ;;  %v2070_v13 = vmul.f32 %v2016_v10, %v2016_v10 }
 0x261   :  { %v2031_v14 = vadd.f32 %v3973_v12, %v5005_v48  ;;  %v2025_v15 = vpop.f32.mrb[25].mxu1  ;;  %3995 = vmatmul.mubr.msk.f32.gmra.mrb[38].mxu1 %vm2080_vm2, %v2021_v7  ;;  %v2102_v24 = vsel %vm2080_vm2, %v2071_v17, 0.0 }
 0x262   :  { %v2026_v18 = vadd.f32 %v5005_v48, %v2025_v15  ;;  %2097 = vadd.xlane.f32.xlu1 %v2096_v16  ;;  %v2099_v19 = vsel %vm2080_vm2, %v2070_v13, 0.0 }
 0x263   :  { %2100 = vadd.xlane.f32.xlu0 %v2099_v19  ;;  %v2073_v25 = vmul.f32 %v2031_v14, %v2031_v14 }
 0x264   :  { %v3976_v20 = vpop.f32.mrb[26].mxu1  ;;  %3997 = vmatprep.mubr.msk.f32.mxu1 %vm2080_vm2, %v2026_v18  ;;  %v2072_v21 = vmul.f32 %v2026_v18, %v2026_v18 }
 0x265   :  { %v2041_v22 = vadd.f32 %v3976_v20, %v5005_v48  ;;  %v2035_v23 = vpop.f32.mrb[27].mxu1  ;;  %3998 = vmatmul.mubr.msk.f32.gmra.mrb[40].mxu1 %vm2080_vm2, %v2031_v14  ;;  %v2108_v32 = vsel %vm2080_vm2, %v2073_v25, 0.0 }
 0x266   :  { %v2036_v26 = vadd.f32 %v5005_v48, %v2035_v23  ;;  %2103 = vadd.xlane.f32.xlu1 %v2102_v24  ;;  %v2105_v27 = vsel %vm2080_vm2, %v2072_v21, 0.0 }
 0x267   :  { %2106 = vadd.xlane.f32.xlu0 %v2105_v27  ;;  %v2075_v33 = vmul.f32 %v2041_v22, %v2041_v22 }
 0x268   :  { %v3979_v28 = vpop.f32.mrb[28].mxu1  ;;  %4000 = vmatprep.mubr.msk.f32.mxu1 %vm2080_vm2, %v2036_v26  ;;  %v2074_v29 = vmul.f32 %v2036_v26, %v2036_v26 }
 0x269   :  { %v2051_v30 = vadd.f32 %v3979_v28, %v5005_v48  ;;  %v2045_v31 = vpop.f32.mrb[29].mxu1  ;;  %4001 = vmatmul.mubr.msk.f32.gmra.mrb[42].mxu1 %vm2080_vm2, %v2041_v22  ;;  %v2114_v40 = vsel %vm2080_vm2, %v2075_v33, 0.0 }
 0x26a   :  { %v2046_v34 = vadd.f32 %v5005_v48, %v2045_v31  ;;  %2109 = vadd.xlane.f32.xlu1 %v2108_v32  ;;  %v2111_v35 = vsel %vm2080_vm2, %v2074_v29, 0.0  ;;  %v5070_v29 = vld [vmem:[%s6558_s6] ss:$0 sm:$0xff] }
 0x26b   :  { %2112 = vadd.xlane.f32.xlu0 %v2111_v35  ;;  %v2077_v41 = vmul.f32 %v2051_v30, %v2051_v30 }
 0x26c   :  { %v3982_v36 = vpop.f32.mrb[30].mxu1  ;;  %4003 = vmatprep.mubr.msk.f32.mxu1 %vm2080_vm2, %v2046_v34  ;;  %v2076_v37 = vmul.f32 %v2046_v34, %v2046_v34 }
 0x26d   :  { %v2061_v38 = vadd.f32 %v3982_v36, %v5005_v48  ;;  %v2055_v39 = vpop.f32.mrb[31].mxu1  ;;  %4004 = vmatmul.mubr.msk.f32.gmra.mrb[44].mxu1 %vm2080_vm2, %v2051_v30  ;;  %v2120_v45 = vsel %vm2080_vm2, %v2077_v41, 0.0 }
 0x26e   :  { %v2056_v42 = vadd.f32 %v5005_v48, %v2055_v39  ;;  %2115 = vadd.xlane.f32.xlu1 %v2114_v40  ;;  %v2117_v43 = vsel %vm2080_vm2, %v2076_v37, 0.0  ;;  %v2370_v48 = vld [vmem:[%s6559_s7] sm:$0xff] }
 0x26f   :  { %2118 = vadd.xlane.f32.xlu0 %v2117_v43  ;;  %v2079_v46 = vmul.f32 %v2061_v38, %v2061_v38  ;;  %v4081_v51 = vpack.c.bf16 %v2371_v50, %v2370_v48 }
 0x270   :  { %4006 = vmatprep.mubr.msk.f32.mxu1 %vm2080_vm2, %v2056_v42  ;;  %v2078_v44 = vmul.f32 %v2056_v42, %v2056_v42 }
 0x271   :  { %4007 = vmatmul.mubr.msk.f32.gmra.mrb[46].mxu1 %vm2080_vm2, %v2061_v38  ;;  %v2126_v49 = vsel %vm2080_vm2, %v2079_v46, 0.0  ;;  %4082 = vmatprep.subr.bf16.mxu1 %v4081_v51 }
 0x272   :  { %2121 = vadd.xlane.f32.xlu1 %v2120_v45  ;;  %v2123_v47 = vsel %vm2080_vm2, %v2078_v44, 0.0  ;;  %4084 = vmatpush3.bf16.msra.mxu1 %v4081_v51 }
 0x273   :  { %2124 = vadd.xlane.f32.xlu0 %v2123_v47  ;;  %4086 = vmatprep.subr.bf16.mxu1 %v4085_v54 }
 0x276   :  { %2127 = vadd.xlane.f32.xlu1 %v2126_v49  ;;  %4088 = vmatpush3.bf16.msra.mxu1 %v4085_v54 }
 0x2e3   :  { %v2086_v55 = vpop.xlane.xlu0 %2085 }
 0x2e7   :  { %v2092_v56 = vpop.xlane.xlu1 %2091  ;;  %v2083_v57 = vpop.xlane.xlu0 %2082 }
 0x2e8   :  { %v2129_v58 = vadd.f32 %v2086_v55, %v2083_v57 }
 0x2eb   :  { %v2089_v59 = vpop.xlane.xlu1 %2088 }
 0x2ec   :  { %v2130_v60 = vadd.f32 %v2129_v58, %v2089_v59  ;;  %v2095_v61 = vpop.xlane.xlu0 %2094 }
 0x2ee   :  { %v2131_v62 = vadd.f32 %v2130_v60, %v2092_v56 }
 0x2ef   :  { %v2098_v63 = vpop.xlane.xlu1 %2097 }
 0x2f0   :  { %v2132_v0 = vadd.f32 %v2131_v62, %v2095_v61  ;;  %v2101_v1 = vpop.xlane.xlu0 %2100 }
 0x2f2   :  { %v2133_v2 = vadd.f32 %v2132_v0, %v2098_v63 }
 0x2f3   :  { %v2104_v4 = vpop.xlane.xlu1 %2103 }
 0x2f4   :  { %v2134_v5 = vadd.f32 %v2133_v2, %v2101_v1  ;;  %v2107_v6 = vpop.xlane.xlu0 %2106 }
 0x2f6   :  { %v2135_v7 = vadd.f32 %v2134_v5, %v2104_v4 }
 0x2f7   :  { %v2110_v3 = vpop.xlane.xlu1 %2109 }
 0x2f8   :  { %v2136_v8 = vadd.f32 %v2135_v7, %v2107_v6  ;;  %v2113_v9 = vpop.xlane.xlu0 %2112 }
 0x2fa   :  { %v2137_v10 = vadd.f32 %v2136_v8, %v2110_v3 }
 0x2fb   :  { %v2116_v11 = vpop.xlane.xlu1 %2115 }
 0x2fc   :  { %v2138_v12 = vadd.f32 %v2137_v10, %v2113_v9  ;;  %v2119_v13 = vpop.xlane.xlu0 %2118 }
 0x2fe   :  { %v2139_v14 = vadd.f32 %v2138_v12, %v2116_v11 }
 0x2ff   :  { %v2122_v15 = vpop.xlane.xlu1 %2121 }
 0x300   :  { %v2140_v16 = vadd.f32 %v2139_v14, %v2119_v13  ;;  %v2125_v18 = vpop.xlane.xlu0 %2124  ;;  %v4300_v14 = vmov 0.0  }
 0x301   :  { %2589 = vst.msk [vmem:[%s6561_s9 + $0x78] sm:$0xff] %vm71_vm0, %v4300_v14  ;;  %2574 = vst.msk [vmem:[%s6561_s9] sm:$0xff] %vm71_vm0, %v4300_v14 }
 0x302   :  { %v2141_v17 = vadd.f32 %v2140_v16, %v2122_v15  ;;  %2575 = vst.msk [vmem:[%s6561_s9 + $0x8] sm:$0xff] %vm71_vm0, %v4300_v14  ;;  %2576 = vst.msk [vmem:[%s6561_s9 + $0x10] sm:$0xff] %vm71_vm0, %v4300_v14  ;;  %v5174_v15 = vld [vmem:[%s6560_s8] ss:$0 sm:$0xff]  ;;  %s4307_s8 = smov 16  }
 0x303   :  { %v2128_v20 = vpop.xlane.xlu1 %2127  ;;  %2577 = vst.msk [vmem:[%s6561_s9 + $0x18] sm:$0xff] %vm71_vm0, %v4300_v14  ;;  %2578 = vst.msk [vmem:[%s6561_s9 + $0x20] sm:$0xff] %vm71_vm0, %v4300_v14 }
 0x304   :  { %v2142_v19 = vadd.f32 %v2141_v17, %v2125_v18  ;;  %2579 = vst.msk [vmem:[%s6561_s9 + $0x28] sm:$0xff] %vm71_vm0, %v4300_v14  ;;  %2580 = vst.msk [vmem:[%s6561_s9 + $0x30] sm:$0xff] %vm71_vm0, %v4300_v14 }
 0x305   :  { %2581 = vst.msk [vmem:[%s6561_s9 + $0x38] sm:$0xff] %vm71_vm0, %v4300_v14  ;;  %2582 = vst.msk [vmem:[%s6561_s9 + $0x40] sm:$0xff] %vm71_vm0, %v4300_v14 }
 0x306   :  { %v2143_v21 = vadd.f32 %v2142_v19, %v2128_v20  ;;  %2583 = vst.msk [vmem:[%s6561_s9 + $0x48] sm:$0xff] %vm71_vm0, %v4300_v14  ;;  %2584 = vst.msk [vmem:[%s6561_s9 + $0x50] sm:$0xff] %vm71_vm0, %v4300_v14 }
 0x307   :  { %2585 = vst.msk [vmem:[%s6561_s9 + $0x58] sm:$0xff] %vm71_vm0, %v4300_v14  ;;  %2586 = vst.msk [vmem:[%s6561_s9 + $0x60] sm:$0xff] %vm71_vm0, %v4300_v14 }
 0x308   :  { %v2144_v22 = vrot.slane %v2143_v21, 4  ;;  %2587 = vst.msk [vmem:[%s6561_s9 + $0x68] sm:$0xff] %vm71_vm0, %v4300_v14  ;;  %2588 = vst.msk [vmem:[%s6561_s9 + $0x70] sm:$0xff] %vm71_vm0, %v4300_v14  ;;  %v2592_v20 = vld [vmem:[%s6561_s9] sm:$0xff] }
 0x309   :  { %2591 = vst.msk [vmem:[%s6561_s9 + $0x80] sm:$0x7f] %vm2590_vm4, %v4300_v14  ;;  %v2593_v17 = vld [vmem:[%s6561_s9 + $0x8] sm:$0xff] }
 0x30a   :  { %v2145_v23 = vadd.f32 %v2144_v22, %v2143_v21 }
 0x30c   :  { %v2146_v24 = vrot.slane %v2145_v23, 2 }
 0x30e   :  { %v2147_v25 = vadd.f32 %v2146_v24, %v2145_v23 }
 0x310   :  { %v2148_v26 = vrot.slane %v2147_v25, 1 }
 0x312   :  { %v2149_v27 = vadd.f32 %v2148_v26, %v2147_v25  ;;  %v2595_v25 = vld [vmem:[%s6561_s9 + $0x18] sm:$0xff] }
 0x314   :  { %v2150_v28 = vmul.f32 0.0009765625, %v2149_v27 }
 0x316   :  { %2152 = vst.msk [vmem:[#allocation2] sm:$0x1] %vm2151_vm3, %v2150_v28  ;;  %v2594_v28 = vld [vmem:[%s6561_s9 + $0x10] sm:$0xff] }
 0x328   :  { %v3987_v30 = vpop.f32.mrb[32].mxu1 }
 0x329   :  { %v2281_v31 = vadd.f32 %v3987_v30, %v5070_v29  ;;  %v2275_v32 = vpop.f32.mrb[33].mxu1 }
 0x32a   :  { %v2276_v33 = vadd.f32 %v5070_v29, %v2275_v32 }
 0x32c   :  { %4244 = vtanh.f32 %v2276_v33  ;;  %v3990_v34 = vpop.f32.mrb[34].mxu1  ;;  %v2597_v33 = vld [vmem:[%s6561_s9 + $0x28] sm:$0xff] }
 0x32d   :  { %4246 = vtanh.f32 %v2281_v31  ;;  %v2291_v35 = vadd.f32 %v3990_v34, %v5070_v29  ;;  %v2285_v36 = vpop.f32.mrb[35].mxu1 }
 0x32e   :  { %v2286_v37 = vadd.f32 %v5070_v29, %v2285_v36  ;;  %v2596_v36 = vld [vmem:[%s6561_s9 + $0x20] sm:$0xff] }
 0x330   :  { %4248 = vtanh.f32 %v2286_v37  ;;  %v3993_v38 = vpop.f32.mrb[36].mxu1 }
 0x331   :  { %4250 = vtanh.f32 %v2291_v35  ;;  %v2301_v39 = vadd.f32 %v3993_v38, %v5070_v29  ;;  %v2295_v40 = vpop.f32.mrb[37].mxu1 }
 0x332   :  { %v2296_v41 = vadd.f32 %v5070_v29, %v2295_v40 }
 0x334   :  { %4252 = vtanh.f32 %v2296_v41  ;;  %v3996_v42 = vpop.f32.mrb[38].mxu1  ;;  %v2599_v41 = vld [vmem:[%s6561_s9 + $0x38] sm:$0xff] }
 0x335   :  { %4254 = vtanh.f32 %v2301_v39  ;;  %v2311_v43 = vadd.f32 %v3996_v42, %v5070_v29  ;;  %v2305_v44 = vpop.f32.mrb[39].mxu1 }
 0x336   :  { %v4245_v45 = vpop.eup %4244  ;;  %v2306_v46 = vadd.f32 %v5070_v29, %v2305_v44  ;;  %v2598_v44 = vld [vmem:[%s6561_s9 + $0x30] sm:$0xff] }
 0x337   :  { %v4247_v47 = vpop.eup %4246  ;;  %4017 = vmatprep.mubr.msk.f32.mxu1 %vm1870_vm1, %v4245_v45 }
 0x338   :  { %4256 = vtanh.f32 %v2306_v46  ;;  %v3999_v49 = vpop.f32.mrb[40].mxu1  ;;  %4018 = vmatmul.mubr.msk.f32.vlgmr.msra.gmra.mrb[48].mxu1 %vm1870_vm1, %v4247_v47 }
 0x339   :  { %4258 = vtanh.f32 %v2311_v43  ;;  %v2321_v48 = vadd.f32 %v3999_v49, %v5070_v29  ;;  %v2315_v50 = vpop.f32.mrb[41].mxu1 }
 0x33a   :  { %v4249_v51 = vpop.eup %4248  ;;  %v2316_v52 = vadd.f32 %v5070_v29, %v2315_v50 }
 0x33b   :  { %v4251_v53 = vpop.eup %4250  ;;  %4020 = vmatprep.mubr.msk.f32.mxu1 %vm1870_vm1, %v4249_v51 }
 0x33c   :  { %4260 = vtanh.f32 %v2316_v52  ;;  %v4002_v54 = vpop.f32.mrb[42].mxu1  ;;  %4021 = vmatmul.mubr.msk.f32.gmra.mrb[50].mxu1 %vm1870_vm1, %v4251_v53  ;;  %v2600_v52 = vld [vmem:[%s6561_s9 + $0x40] sm:$0xff] }
 0x33d   :  { %4262 = vtanh.f32 %v2321_v48  ;;  %v2331_v55 = vadd.f32 %v4002_v54, %v5070_v29  ;;  %v2325_v56 = vpop.f32.mrb[43].mxu1  ;;  %v2601_v48 = vld [vmem:[%s6561_s9 + $0x48] sm:$0xff] }
 0x33e   :  { %v4253_v57 = vpop.eup %4252  ;;  %v2326_v58 = vadd.f32 %v5070_v29, %v2325_v56 }
 0x33f   :  { %v4255_v59 = vpop.eup %4254  ;;  %4023 = vmatprep.mubr.msk.f32.mxu1 %vm1870_vm1, %v4253_v57  ;;  %v2603_v57 = vld [vmem:[%s6561_s9 + $0x58] sm:$0xff] }
 0x340   :  { %4264 = vtanh.f32 %v2326_v58  ;;  %v4005_v60 = vpop.f32.mrb[44].mxu1  ;;  %4024 = vmatmul.mubr.msk.f32.gmra.mrb[52].mxu1 %vm1870_vm1, %v4255_v59 }
 0x341   :  { %4266 = vtanh.f32 %v2331_v55  ;;  %v2341_v61 = vadd.f32 %v4005_v60, %v5070_v29  ;;  %v2335_v62 = vpop.f32.mrb[45].mxu1  ;;  %v2602_v60 = vld [vmem:[%s6561_s9 + $0x50] sm:$0xff] }
 0x342   :  { %v4257_v63 = vpop.eup %4256  ;;  %v2336_v0 = vadd.f32 %v5070_v29, %v2335_v62 }
 0x343   :  { %v4259_v1 = vpop.eup %4258  ;;  %4026 = vmatprep.mubr.msk.f32.mxu1 %vm1870_vm1, %v4257_v63 }
 0x344   :  { %4268 = vtanh.f32 %v2336_v0  ;;  %v4008_v2 = vpop.f32.mrb[46].mxu1  ;;  %4027 = vmatmul.mubr.msk.f32.gmra.mrb[54].mxu1 %vm1870_vm1, %v4259_v1  ;;  %v2605_v1 = vld [vmem:[%s6561_s9 + $0x68] sm:$0xff] }
 0x345   :  { %4270 = vtanh.f32 %v2341_v61  ;;  %v2351_v4 = vadd.f32 %v4008_v2, %v5070_v29  ;;  %v2345_v5 = vpop.f32.mrb[47].mxu1 }
 0x346   :  { %v4261_v6 = vpop.eup %4260  ;;  %v2346_v7 = vadd.f32 %v5070_v29, %v2345_v5  ;;  %v2604_v5 = vld [vmem:[%s6561_s9 + $0x60] sm:$0xff] }
 0x347   :  { %v4263_v3 = vpop.eup %4262  ;;  %4029 = vmatprep.mubr.msk.f32.mxu1 %vm1870_vm1, %v4261_v6 }
 0x348   :  { %4272 = vtanh.f32 %v2346_v7  ;;  %4030 = vmatmul.mubr.msk.f32.gmra.mrb[56].mxu1 %vm1870_vm1, %v4263_v3 }
 0x349   :  { %4274 = vtanh.f32 %v2351_v4 }
 0x34a   :  { %v4265_v8 = vpop.eup %4264 }
 0x34b   :  { %v4267_v9 = vpop.eup %4266  ;;  %4032 = vmatprep.mubr.msk.f32.mxu1 %vm1870_vm1, %v4265_v8  ;;  %v2607_v8 = vld [vmem:[%s6561_s9 + $0x78] sm:$0xff] }
 0x34c   :  { %4033 = vmatmul.mubr.msk.f32.gmra.mrb[58].mxu1 %vm1870_vm1, %v4267_v9 }
 0x34e   :  { %v4269_v10 = vpop.eup %4268 }
 0x34f   :  { %v4271_v11 = vpop.eup %4270  ;;  %4035 = vmatprep.mubr.msk.f32.mxu1 %vm1870_vm1, %v4269_v10 }
 0x350   :  { %4036 = vmatmul.mubr.msk.f32.gmra.mrb[60].mxu1 %vm1870_vm1, %v4271_v11 }
 0x352   :  { %v4273_v12 = vpop.eup %4272 }
 0x353   :  { %v4275_v13 = vpop.eup %4274  ;;  %4038 = vmatprep.mubr.msk.f32.mxu1 %vm1870_vm1, %v4273_v12  ;;  %v2606_v12 = vld [vmem:[%s6561_s9 + $0x70] sm:$0xff] }
 0x354   :  { %4039 = vmatmul.mubr.msk.f32.gmra.mrb[62].mxu1 %vm1870_vm1, %v4275_v13 }
 0x40b   :  { %v4019_v16 = vpop.f32.mrb[48].mxu1 }
 0x40c   :  { %v5180_v18 = vadd.f32 %v4019_v16, %v5174_v15  ;;  %v2495_v19 = vpop.f32.mrb[49].mxu1 }
 0x40d   :  { %v5186_v21 = vadd.f32 %v5174_v15, %v2495_v19 }
 0x40e   :  { %2674 = vrot.lane.b32.xlu1 %v5180_v18, %s4301_s0  ;;  %v2609_v22 = vadd.f32 %v2593_v17, %v5180_v18 }
 0x40f   :  { %v4022_v23 = vpop.f32.mrb[50].mxu1  ;;  %2672 = vrot.lane.b32.xlu0 %v5186_v21, %s4301_s0  ;;  %v2608_v24 = vadd.f32 %v2592_v20, %v5186_v21 }
 0x410   :  { %v5198_v26 = vadd.f32 %v4022_v23, %v5174_v15  ;;  %v2505_v27 = vpop.f32.mrb[51].mxu1  ;;  %2625 = vst.msk [vmem:[%s6561_s9 + $0x8] sm:$0xff] %vm71_vm0, %v2609_v22 }
 0x411   :  { %v5208_v29 = vadd.f32 %v5174_v15, %v2505_v27  ;;  %2624 = vst.msk [vmem:[%s6561_s9] sm:$0xff] %vm71_vm0, %v2608_v24 }
 0x412   :  { %2770 = vrot.lane.b32.xlu1 %v5180_v18, %s4302_s26  ;;  %v2611_v30 = vadd.f32 %v2595_v25, %v5198_v26 }
 0x413   :  { %v4025_v31 = vpop.f32.mrb[52].mxu1  ;;  %2768 = vrot.lane.b32.xlu0 %v5186_v21, %s4302_s26  ;;  %v2610_v32 = vadd.f32 %v2594_v28, %v5208_v29 }
 0x414   :  { %v5224_v34 = vadd.f32 %v4025_v31, %v5174_v15  ;;  %v2515_v35 = vpop.f32.mrb[53].mxu1  ;;  %2627 = vst.msk [vmem:[%s6561_s9 + $0x18] sm:$0xff] %vm71_vm0, %v2611_v30 }
 0x415   :  { %v5234_v37 = vadd.f32 %v5174_v15, %v2515_v35  ;;  %2626 = vst.msk [vmem:[%s6561_s9 + $0x10] sm:$0xff] %vm71_vm0, %v2610_v32 }
 0x416   :  { %2866 = vrot.lane.b32.xlu1 %v5180_v18, %s4303_s13  ;;  %v2613_v38 = vadd.f32 %v2597_v33, %v5224_v34 }
 0x417   :  { %v4028_v39 = vpop.f32.mrb[54].mxu1  ;;  %2864 = vrot.lane.b32.xlu0 %v5186_v21, %s4303_s13  ;;  %v2612_v40 = vadd.f32 %v2596_v36, %v5234_v37 }
 0x418   :  { %v5250_v42 = vadd.f32 %v4028_v39, %v5174_v15  ;;  %v2525_v43 = vpop.f32.mrb[55].mxu1  ;;  %2629 = vst.msk [vmem:[%s6561_s9 + $0x28] sm:$0xff] %vm71_vm0, %v2613_v38  ;;  %v2640_v20 = vld [vmem:[%s6561_s9 + $0x1] sm:$0xff] }
 0x419   :  { %v5260_v45 = vadd.f32 %v5174_v15, %v2525_v43  ;;  %2628 = vst.msk [vmem:[%s6561_s9 + $0x20] sm:$0xff] %vm71_vm0, %v2612_v40 }
 0x41a   :  { %2962 = vrot.lane.b32.xlu1 %v5180_v18, %s4304_s21  ;;  %v2615_v46 = vadd.f32 %v2599_v41, %v5250_v42 }
 0x41b   :  { %v4031_v47 = vpop.f32.mrb[56].mxu1  ;;  %2960 = vrot.lane.b32.xlu0 %v5186_v21, %s4304_s21  ;;  %v2614_v49 = vadd.f32 %v2598_v44, %v5260_v45 }
 0x41c   :  { %v5276_v50 = vadd.f32 %v4031_v47, %v5174_v15  ;;  %v2535_v51 = vpop.f32.mrb[57].mxu1  ;;  %2631 = vst.msk [vmem:[%s6561_s9 + $0x38] sm:$0xff] %vm71_vm0, %v2615_v46  ;;  %v2641_v17 = vld [vmem:[%s6561_s9 + $0x9] sm:$0xff] }
 0x41d   :  { %v5286_v53 = vadd.f32 %v5174_v15, %v2535_v51  ;;  %2630 = vst.msk [vmem:[%s6561_s9 + $0x30] sm:$0xff] %vm71_vm0, %v2614_v49 }
 0x41e   :  { %3058 = vrot.lane.b32.xlu1 %v5180_v18, %s4305_s25  ;;  %v2617_v54 = vadd.f32 %v2601_v48, %v5276_v50 }
 0x41f   :  { %v4034_v55 = vpop.f32.mrb[58].mxu1  ;;  %3056 = vrot.lane.b32.xlu0 %v5186_v21, %s4305_s25  ;;  %v2616_v56 = vadd.f32 %v2600_v52, %v5286_v53 }
 0x420   :  { %v5302_v58 = vadd.f32 %v4034_v55, %v5174_v15  ;;  %v2545_v59 = vpop.f32.mrb[59].mxu1  ;;  %2633 = vst.msk [vmem:[%s6561_s9 + $0x48] sm:$0xff] %vm71_vm0, %v2617_v54  ;;  %v2643_v41 = vld [vmem:[%s6561_s9 + $0x19] sm:$0xff] }
 0x421   :  { %v5312_v61 = vadd.f32 %v5174_v15, %v2545_v59  ;;  %2632 = vst.msk [vmem:[%s6561_s9 + $0x40] sm:$0xff] %vm71_vm0, %v2616_v56 }
 0x422   :  { %3154 = vrot.lane.b32.xlu1 %v5180_v18, %s4306_s14  ;;  %v2619_v62 = vadd.f32 %v2603_v57, %v5302_v58  ;;  %v2644_v57 = vld [vmem:[%s6561_s9 + $0x21] sm:$0xff] }
 0x423   :  { %v4037_v63 = vpop.f32.mrb[60].mxu1  ;;  %3152 = vrot.lane.b32.xlu0 %v5186_v21, %s4306_s14  ;;  %v2618_v0 = vadd.f32 %v2602_v60, %v5312_v61 }
 0x424   :  { %v5328_v2 = vadd.f32 %v4037_v63, %v5174_v15  ;;  %v2555_v4 = vpop.f32.mrb[61].mxu1  ;;  %2635 = vst.msk [vmem:[%s6561_s9 + $0x58] sm:$0xff] %vm71_vm0, %v2619_v62  ;;  %v2642_v63 = vld [vmem:[%s6561_s9 + $0x11] sm:$0xff] }
 0x425   :  { %v5338_v6 = vadd.f32 %v5174_v15, %v2555_v4  ;;  %2634 = vst.msk [vmem:[%s6561_s9 + $0x50] sm:$0xff] %vm71_vm0, %v2618_v0  ;;  %v2645_v4 = vld [vmem:[%s6561_s9 + $0x29] sm:$0xff] }
 0x426   :  { %2678 = vrot.lane.b32.xlu1 %v5198_v26, %s4301_s0  ;;  %v2621_v7 = vadd.f32 %v2605_v1, %v5328_v2 }
 0x427   :  { %v4040_v3 = vpop.f32.mrb[62].mxu1  ;;  %2772 = vrot.lane.b32.xlu0 %v5208_v29, %s4302_s26  ;;  %v2620_v9 = vadd.f32 %v2604_v5, %v5338_v6 }
 0x428   :  { %v5354_v10 = vadd.f32 %v4040_v3, %v5174_v15  ;;  %v2565_v11 = vpop.f32.mrb[63].mxu1  ;;  %2637 = vst.msk [vmem:[%s6561_s9 + $0x68] sm:$0xff] %vm71_vm0, %v2621_v7 }
 0x429   :  { %v5364_v13 = vadd.f32 %v5174_v15, %v2565_v11  ;;  %2636 = vst.msk [vmem:[%s6561_s9 + $0x60] sm:$0xff] %vm71_vm0, %v2620_v9 }
 0x42a   :  { %v2623_v14 = vadd.f32 %v2607_v8, %v5354_v10  ;;  %2774 = vrot.lane.b32.xlu1 %v5198_v26, %s4302_s26 }
 0x42b   :  { %2868 = vrot.lane.b32.xlu0 %v5208_v29, %s4303_s13  ;;  %v2622_v16 = vadd.f32 %v2606_v12, %v5364_v13 }
 0x42c   :  { %2639 = vst.msk [vmem:[%s6561_s9 + $0x78] sm:$0xff] %vm71_vm0, %v2623_v14 }
 0x42d   :  { %2638 = vst.msk [vmem:[%s6561_s9 + $0x70] sm:$0xff] %vm71_vm0, %v2622_v16 }
 0x42e   :  { %2870 = vrot.lane.b32.xlu1 %v5198_v26, %s4303_s13 }
 0x42f   :  { %2964 = vrot.lane.b32.xlu0 %v5208_v29, %s4304_s21 }
 0x432   :  { %2966 = vrot.lane.b32.xlu1 %v5198_v26, %s4304_s21 }
 0x433   :  { %3060 = vrot.lane.b32.xlu0 %v5208_v29, %s4305_s25 }
 0x436   :  { %3062 = vrot.lane.b32.xlu1 %v5198_v26, %s4305_s25 }
 0x437   :  { %3156 = vrot.lane.b32.xlu0 %v5208_v29, %s4306_s14 }
 0x43a   :  { %3158 = vrot.lane.b32.xlu1 %v5198_v26, %s4306_s14 }
 0x43b   :  { %2680 = vrot.lane.b32.xlu0 %v5234_v37, %s4301_s0 }
 0x43e   :  { %2676 = vrot.lane.b32.xlu1 %v5208_v29, %s4301_s0 }
 0x43f   :  { %2776 = vrot.lane.b32.xlu0 %v5234_v37, %s4302_s26 }
 0x442   :  { %2682 = vrot.lane.b32.xlu1 %v5224_v34, %s4301_s0 }
 0x443   :  { %2872 = vrot.lane.b32.xlu0 %v5234_v37, %s4303_s13 }
 0x446   :  { %2778 = vrot.lane.b32.xlu1 %v5224_v34, %s4302_s26 }
 0x447   :  { %2968 = vrot.lane.b32.xlu0 %v5234_v37, %s4304_s21 }
 0x44a   :  { %2874 = vrot.lane.b32.xlu1 %v5224_v34, %s4303_s13 }
 0x44b   :  { %3064 = vrot.lane.b32.xlu0 %v5234_v37, %s4305_s25 }
 0x44e   :  { %2970 = vrot.lane.b32.xlu1 %v5224_v34, %s4304_s21 }
 0x44f   :  { %3160 = vrot.lane.b32.xlu0 %v5234_v37, %s4306_s14 }
 0x452   :  { %3066 = vrot.lane.b32.xlu1 %v5224_v34, %s4305_s25 }
 0x453   :  { %2684 = vrot.lane.b32.xlu0 %v5260_v45, %s4301_s0 }
 0x456   :  { %3162 = vrot.lane.b32.xlu1 %v5224_v34, %s4306_s14 }
 0x457   :  { %2780 = vrot.lane.b32.xlu0 %v5260_v45, %s4302_s26 }
 0x45a   :  { %2686 = vrot.lane.b32.xlu1 %v5250_v42, %s4301_s0 }
 0x45b   :  { %2876 = vrot.lane.b32.xlu0 %v5260_v45, %s4303_s13 }
 0x45e   :  { %2782 = vrot.lane.b32.xlu1 %v5250_v42, %s4302_s26 }
 0x45f   :  { %2972 = vrot.lane.b32.xlu0 %v5260_v45, %s4304_s21 }
 0x462   :  { %2878 = vrot.lane.b32.xlu1 %v5250_v42, %s4303_s13 }
 0x463   :  { %3068 = vrot.lane.b32.xlu0 %v5260_v45, %s4305_s25 }
 0x466   :  { %2974 = vrot.lane.b32.xlu1 %v5250_v42, %s4304_s21 }
 0x467   :  { %3164 = vrot.lane.b32.xlu0 %v5260_v45, %s4306_s14 }
 0x46a   :  { %3070 = vrot.lane.b32.xlu1 %v5250_v42, %s4305_s25 }
 0x46b   :  { %2688 = vrot.lane.b32.xlu0 %v5286_v53, %s4301_s0 }
 0x46e   :  { %3166 = vrot.lane.b32.xlu1 %v5250_v42, %s4306_s14 }
 0x46f   :  { %2784 = vrot.lane.b32.xlu0 %v5286_v53, %s4302_s26 }
 0x472   :  { %2690 = vrot.lane.b32.xlu1 %v5276_v50, %s4301_s0 }
 0x473   :  { %2880 = vrot.lane.b32.xlu0 %v5286_v53, %s4303_s13 }
 0x476   :  { %2786 = vrot.lane.b32.xlu1 %v5276_v50, %s4302_s26 }
 0x477   :  { %2976 = vrot.lane.b32.xlu0 %v5286_v53, %s4304_s21 }
 0x47a   :  { %2882 = vrot.lane.b32.xlu1 %v5276_v50, %s4303_s13 }
 0x47b   :  { %3072 = vrot.lane.b32.xlu0 %v5286_v53, %s4305_s25 }
 0x47e   :  { %2978 = vrot.lane.b32.xlu1 %v5276_v50, %s4304_s21 }
 0x47f   :  { %3168 = vrot.lane.b32.xlu0 %v5286_v53, %s4306_s14 }
 0x480   :  { %v2675_v15 = vpop.permute.xlu1 %2674 }
 0x481   :  { %v2721_v19 = vadd.f32 %v2675_v15, %v2641_v17  ;;  %v2673_v22 = vpop.permute.xlu0 %2672 }
 0x482   :  { %v2720_v23 = vadd.f32 %v2673_v22, %v2640_v20  ;;  %3074 = vrot.lane.b32.xlu1 %v5276_v50, %s4305_s25 }
 0x483   :  { %2737 = vst.msk [vmem:[%s6561_s9 + $0x9] sm:$0xff] %vm71_vm0, %v2721_v19  ;;  %2692 = vrot.lane.b32.xlu0 %v5312_v61, %s4301_s0 }
 0x484   :  { %2736 = vst.msk [vmem:[%s6561_s9 + $0x1] sm:$0xff] %vm71_vm0, %v2720_v23  ;;  %v5486_v24 = vpop.permute.xlu1 %2770 }
 0x485   :  { %v2769_v25 = vpop.permute.xlu0 %2768 }
 0x486   :  { %3170 = vrot.lane.b32.xlu1 %v5276_v50, %s4306_s14 }
 0x487   :  { %2788 = vrot.lane.b32.xlu0 %v5312_v61, %s4302_s26 }
 0x488   :  { %v5492_v27 = vpop.permute.xlu1 %2866 }
 0x489   :  { %v5494_v28 = vpop.permute.xlu0 %2864 }
 0x48a   :  { %2694 = vrot.lane.b32.xlu1 %v5302_v58, %s4301_s0 }
 0x48b   :  { %v2752_v30 = vld [vmem:[%s6561_s9 + $0x2] sm:$0xff]  ;;  %2884 = vrot.lane.b32.xlu0 %v5312_v61, %s4303_s13 }
 0x48c   :  { %v2816_v31 = vadd.f32 %v2769_v25, %v2752_v30  ;;  %v5503_v32 = vpop.permute.xlu1 %2962 }
 0x48d   :  { %v5505_v33 = vpop.permute.xlu0 %2960 }
 0x48e   :  { %2832 = vst.msk [vmem:[%s6561_s9 + $0x2] sm:$0xff] %vm71_vm0, %v2816_v31  ;;  %2790 = vrot.lane.b32.xlu1 %v5302_v58, %s4302_s26 }
 0x48f   :  { %2980 = vrot.lane.b32.xlu0 %v5312_v61, %s4304_s21 }
 0x490   :  { %v5515_v35 = vpop.permute.xlu1 %3058 }
 0x491   :  { %v5517_v36 = vpop.permute.xlu0 %3056 }
 0x492   :  { %2886 = vrot.lane.b32.xlu1 %v5302_v58, %s4303_s13 }
 0x493   :  { %3076 = vrot.lane.b32.xlu0 %v5312_v61, %s4305_s25 }
 0x494   :  { %v5523_v38 = vpop.permute.xlu1 %3154 }
 0x495   :  { %v5525_v39 = vpop.permute.xlu0 %3152 }
 0x496   :  { %2982 = vrot.lane.b32.xlu1 %v5302_v58, %s4304_s21 }
 0x497   :  { %2696 = vrot.lane.b32.xlu0 %v5338_v6, %s4301_s0 }
 0x498   :  { %v2679_v40 = vpop.permute.xlu1 %2678 }
 0x499   :  { %v2723_v43 = vadd.f32 %v2679_v40, %v2643_v41  ;;  %v2773_v44 = vpop.permute.xlu0 %2772 }
 0x49a   :  { %3078 = vrot.lane.b32.xlu1 %v5302_v58, %s4305_s25 }
 0x49b   :  { %2739 = vst.msk [vmem:[%s6561_s9 + $0x19] sm:$0xff] %vm71_vm0, %v2723_v43  ;;  %2792 = vrot.lane.b32.xlu0 %v5338_v6, %s4302_s26 }
 0x49c   :  { %v2775_v46 = vpop.permute.xlu1 %2774 }
 0x49d   :  { %v5542_v47 = vpop.permute.xlu0 %2868 }
 0x49e   :  { %2698 = vrot.lane.b32.xlu1 %v5328_v2, %s4301_s0 }
 0x49f   :  { %2888 = vrot.lane.b32.xlu0 %v5338_v6, %s4303_s13 }
 0x4a0   :  { %v5548_v49 = vpop.permute.xlu1 %2870 }
 0x4a1   :  { %v5550_v48 = vpop.permute.xlu0 %2964 }
 0x4a2   :  { %2794 = vrot.lane.b32.xlu1 %v5328_v2, %s4302_s26 }
 0x4a3   :  { %2984 = vrot.lane.b32.xlu0 %v5338_v6, %s4304_s21 }
 0x4a4   :  { %v5556_v51 = vpop.permute.xlu1 %2966 }
 0x4a5   :  { %v5558_v52 = vpop.permute.xlu0 %3060 }
 0x4a6   :  { %2890 = vrot.lane.b32.xlu1 %v5328_v2, %s4303_s13 }
 0x4a7   :  { %3080 = vrot.lane.b32.xlu0 %v5338_v6, %s4305_s25 }
 0x4a8   :  { %v5564_v54 = vpop.permute.xlu1 %3062 }
 0x4a9   :  { %v5566_v55 = vpop.permute.xlu0 %3156 }
 0x4aa   :  { %2986 = vrot.lane.b32.xlu1 %v5328_v2, %s4304_s21 }
 0x4ab   :  { %2700 = vrot.lane.b32.xlu0 %v5364_v13, %s4301_s0 }
 0x4ac   :  { %v5572_v56 = vpop.permute.xlu1 %3158 }
 0x4ad   :  { %v2681_v59 = vpop.permute.xlu0 %2680 }
 0x4ae   :  { %v2724_v60 = vadd.f32 %v2681_v59, %v2644_v57  ;;  %3082 = vrot.lane.b32.xlu1 %v5328_v2, %s4305_s25 }
 0x4af   :  { %3172 = vrot.lane.b32.xlu0 %v5312_v61, %s4306_s14 }
 0x4b0   :  { %2740 = vst.msk [vmem:[%s6561_s9 + $0x21] sm:$0xff] %vm71_vm0, %v2724_v60  ;;  %v2677_v62 = vpop.permute.xlu1 %2676  ;;  %v2647_v60 = vld [vmem:[%s6561_s9 + $0x39] sm:$0xff] }
 0x4b1   :  { %v2722_v0 = vadd.f32 %v2677_v62, %v2642_v63  ;;  %v2777_v1 = vpop.permute.xlu0 %2776 }
 0x4b2   :  { %2702 = vrot.lane.b32.xlu1 %v5354_v10, %s4301_s0 }
 0x4b3   :  { %2738 = vst.msk [vmem:[%s6561_s9 + $0x11] sm:$0xff] %vm71_vm0, %v2722_v0  ;;  %2796 = vrot.lane.b32.xlu0 %v5364_v13, %s4302_s26 }
 0x4b4   :  { %v2683_v5 = vpop.permute.xlu1 %2682 }
 0x4b5   :  { %v2725_v7 = vadd.f32 %v2683_v5, %v2645_v4  ;;  %v5599_v3 = vpop.permute.xlu0 %2872 }
 0x4b6   :  { %2798 = vrot.lane.b32.xlu1 %v5354_v10, %s4302_s26  ;;  %s3336_s26 = sshll.u32 %s4308_s19, 4  ;;  %s3337_s26 = int_to_ptr.vmem [resolvable:$true] %s3336_s26 }
 0x4b7   :  { %v2755_v8 = vld [vmem:[%s6561_s9 + $0x1a] sm:$0xff]  ;;  %2741 = vst.msk [vmem:[%s6561_s9 + $0x29] sm:$0xff] %vm71_vm0, %v2725_v7  ;;  %3176 = vrot.lane.b32.xlu0 %v5338_v6, %s4306_s14  ;;  %s4280_s22 = scalar_lea.vmem %s3337_s26, 32  ;;  %p4281_p1 = scmp.lt.s32.totalorder %s3337_s26, %s3337_s26 }
 0x4b8   :  { %v2819_v9 = vadd.f32 %v2775_v46, %v2755_v8  ;;  %v2779_v11 = vpop.permute.xlu1 %2778 }
 0x4b9   :  { %v5612_v12 = vpop.permute.xlu0 %2968 }
 0x4ba   :  { %2835 = vst.msk [vmem:[%s6561_s9 + $0x1a] sm:$0xff] %vm71_vm0, %v2819_v9  ;;  %v2753_v14 = vld [vmem:[%s6561_s9 + $0xa] sm:$0xff]  ;;  %v2754_v16 = vld [vmem:[%s6561_s9 + $0x12] sm:$0xff]  ;;  %2894 = vrot.lane.b32.xlu1 %v5354_v10, %s4303_s13 }
 0x4bb   :  { %v2817_v15 = vadd.f32 %v5486_v24, %v2753_v14  ;;  %v2818_v17 = vadd.f32 %v2773_v44, %v2754_v16  ;;  %3248 = vrot.lane.b32.xlu0 %v5186_v21, %s4307_s8  ;;  %v2646_v44 = vld [vmem:[%s6561_s9 + $0x31] sm:$0xff] }
 0x4bc   :  { %v5629_v19 = vpop.permute.xlu1 %2874 }
 0x4bd   :  { %2833 = vst.msk [vmem:[%s6561_s9 + $0xa] sm:$0xff] %vm71_vm0, %v2817_v15  ;;  %2834 = vst.msk [vmem:[%s6561_s9 + $0x12] sm:$0xff] %vm71_vm0, %v2818_v17  ;;  %v5639_v20 = vpop.permute.xlu0 %3064 }
 0x4be   :  { %v2756_v22 = vld [vmem:[%s6561_s9 + $0x22] sm:$0xff]  ;;  %2990 = vrot.lane.b32.xlu1 %v5354_v10, %s4304_s21 }
 0x4bf   :  { %v2820_v21 = vadd.f32 %v2777_v1, %v2756_v22  ;;  %2892 = vrot.lane.b32.xlu0 %v5364_v13, %s4303_s13 }
 0x4c0   :  { %v5648_v23 = vpop.permute.xlu1 %2970 }
 0x4c1   :  { %2836 = vst.msk [vmem:[%s6561_s9 + $0x22] sm:$0xff] %vm71_vm0, %v2820_v21  ;;  %v5654_v24 = vpop.permute.xlu0 %3160 }
 0x4c2   :  { %3086 = vrot.lane.b32.xlu1 %v5354_v10, %s4305_s25 }
 0x4c3   :  { %3252 = vrot.lane.b32.xlu0 %v5208_v29, %s4307_s8 }
 0x4c4   :  { %v2848_v25 = vld [vmem:[%s6561_s9 + $0x3] sm:$0xff]  ;;  %v2849_v30 = vld [vmem:[%s6561_s9 + $0xb] sm:$0xff]  ;;  %v2850_v31 = vld [vmem:[%s6561_s9 + $0x13] sm:$0xff]  ;;  %v5669_v40 = vpop.permute.xlu1 %3066 }
 0x4c5   :  { %v2912_v41 = vadd.f32 %v5494_v28, %v2848_v25  ;;  %v2913_v43 = vadd.f32 %v5492_v27, %v2849_v30  ;;  %v2914_v29 = vadd.f32 %v5542_v47, %v2850_v31  ;;  %v2685_v46 = vpop.permute.xlu0 %2684 }
 0x4c6   :  { %v2726_v57 = vadd.f32 %v2685_v46, %v2646_v44  ;;  %3174 = vrot.lane.b32.xlu1 %v5302_v58, %s4306_s14 }
 0x4c7   :  { %2928 = vst.msk [vmem:[%s6561_s9 + $0x3] sm:$0xff] %vm71_vm0, %v2912_v41  ;;  %2929 = vst.msk [vmem:[%s6561_s9 + $0xb] sm:$0xff] %vm71_vm0, %v2913_v43  ;;  %2988 = vrot.lane.b32.xlu0 %v5364_v13, %s4304_s21 }
 0x4c8   :  { %2930 = vst.msk [vmem:[%s6561_s9 + $0x13] sm:$0xff] %vm71_vm0, %v2914_v29  ;;  %v2851_v27 = vld [vmem:[%s6561_s9 + $0x1b] sm:$0xff]  ;;  %2742 = vst.msk [vmem:[%s6561_s9 + $0x31] sm:$0xff] %vm71_vm0, %v2726_v57  ;;  %v5700_v28 = vpop.permute.xlu1 %3162 }
 0x4c9   :  { %v2915_v47 = vadd.f32 %v5548_v49, %v2851_v27  ;;  %v2781_v59 = vpop.permute.xlu0 %2780 }
 0x4ca   :  { %3178 = vrot.lane.b32.xlu1 %v5328_v2, %s4306_s14 }
 0x4cb   :  { %2931 = vst.msk [vmem:[%s6561_s9 + $0x1b] sm:$0xff] %vm71_vm0, %v2915_v47  ;;  %3256 = vrot.lane.b32.xlu0 %v5234_v37, %s4307_s8 }
 0x4cc   :  { %v2687_v62 = vpop.permute.xlu1 %2686 }
 0x4cd   :  { %v2727_v63 = vadd.f32 %v2687_v62, %v2647_v60  ;;  %v5714_v0 = vpop.permute.xlu0 %2876 }
 0x4ce   :  { %3182 = vrot.lane.b32.xlu1 %v5354_v10, %s4306_s14  ;;  %v2944_v49 = vld [vmem:[%s6561_s9 + $0x4] sm:$0xff] }
 0x4cf   :  { %v2945_v1 = vld [vmem:[%s6561_s9 + $0xc] sm:$0xff]  ;;  %2743 = vst.msk [vmem:[%s6561_s9 + $0x39] sm:$0xff] %vm71_vm0, %v2727_v63  ;;  %3260 = vrot.lane.b32.xlu0 %v5260_v45, %s4307_s8  ;;  %v3008_v4 = vadd.f32 %v5505_v33, %v2944_v49 }
 0x4d0   :  { %v2757_v37 = vld [vmem:[%s6561_s9 + $0x2a] sm:$0xff]  ;;  %v3009_v5 = vadd.f32 %v5503_v32, %v2945_v1  ;;  %v5735_v8 = vpop.permute.xlu1 %2782 }
 0x4d1   :  { %v2821_v7 = vadd.f32 %v2779_v11, %v2757_v37  ;;  %v5737_v9 = vpop.permute.xlu0 %2972  ;;  %3024 = vst.msk [vmem:[%s6561_s9 + $0x4] sm:$0xff] %vm71_vm0, %v3008_v4 }
 0x4d2   :  { %3025 = vst.msk [vmem:[%s6561_s9 + $0xc] sm:$0xff] %vm71_vm0, %v3009_v5  ;;  %3250 = vrot.lane.b32.xlu1 %v5180_v18, %s4307_s8  ;;  %v2946_v45 = vld [vmem:[%s6561_s9 + $0x14] sm:$0xff] }
 0x4d3   :  { %2837 = vst.msk [vmem:[%s6561_s9 + $0x2a] sm:$0xff] %vm71_vm0, %v2821_v7  ;;  %3084 = vrot.lane.b32.xlu0 %v5364_v13, %s4305_s25  ;;  %v3010_v32 = vadd.f32 %v5550_v48, %v2946_v45  ;;  %s4276_s25 = scalar_lea.vmem %s3337_s26, 16 }
 0x4d4   :  { %v5759_v33 = vpop.permute.xlu1 %2878  ;;  %p4277_p0 = scmp.ne.s32.totalorder %s3337_s26, %s4276_s25  ;;  %p4282_p2 = scmp.lt.s32.totalorder %s4280_s22, %s4276_s25 }
 0x4d5   :  { %v5761_v11 = vpop.permute.xlu0 %3068  ;;  %3026 = vst.msk [vmem:[%s6561_s9 + $0x14] sm:$0xff] %vm71_vm0, %v3010_v32 }
 0x4d6   :  { %v2758_v18 = vld [vmem:[%s6561_s9 + $0x32] sm:$0xff]  ;;  %3254 = vrot.lane.b32.xlu1 %v5198_v26, %s4307_s8  ;;  %p4283_p3 = por %p4282_p2, %p4281_p1 }
 0x4d7   :  { %v2822_v14 = vadd.f32 %v2781_v59, %v2758_v18  ;;  %3264 = vrot.lane.b32.xlu0 %v5286_v53, %s4307_s8 }
 0x4d8   :  { %v5774_v48 = vpop.permute.xlu1 %2974  ;;  %p4284_p4 = pnand %p4283_p3, %p4277_p0 }
 0x4d9   :  { %v3040_v16 = vld [vmem:[%s6561_s9 + $0x5] sm:$0xff]  ;;  %2838 = vst.msk [vmem:[%s6561_s9 + $0x32] sm:$0xff] %vm71_vm0, %v2822_v14  ;;  %v5786_v26 = vpop.permute.xlu0 %3164 }
 0x4da   :  { %v2852_v15 = vld [vmem:[%s6561_s9 + $0x23] sm:$0xff]  ;;  %v3104_v17 = vadd.f32 %v5517_v36, %v3040_v16  ;;  %3258 = vrot.lane.b32.xlu1 %v5224_v34, %s4307_s8 }
 0x4db   :  { %v2916_v53 = vadd.f32 %v5599_v3, %v2852_v15  ;;  %3180 = vrot.lane.b32.xlu0 %v5364_v13, %s4306_s14  ;;  %v2648_v34 = vld [vmem:[%s6561_s9 + $0x41] sm:$0xff] }
 0x4dc   :  { %3120 = vst.msk [vmem:[%s6561_s9 + $0x5] sm:$0xff] %vm71_vm0, %v3104_v17  ;;  %v5802_v22 = vpop.permute.xlu1 %3070  ;;  %v3041_v36 = vld [vmem:[%s6561_s9 + $0xd] sm:$0xff] }
 0x4dd   :  { %2932 = vst.msk [vmem:[%s6561_s9 + $0x23] sm:$0xff] %vm71_vm0, %v2916_v53  ;;  %v2689_v3 = vpop.permute.xlu0 %2688  ;;  %v3105_v21 = vadd.f32 %v5515_v35, %v3041_v36 }
 0x4de   :  { %v2728_v25 = vadd.f32 %v2689_v3, %v2648_v34  ;;  %3262 = vrot.lane.b32.xlu1 %v5250_v42, %s4307_s8 }
 0x4df   :  { %3268 = vrot.lane.b32.xlu0 %v5312_v61, %s4307_s8  ;;  %3121 = vst.msk [vmem:[%s6561_s9 + $0xd] sm:$0xff] %vm71_vm0, %v3105_v21 }
 0x4e0   :  { %v2853_v30 = vld [vmem:[%s6561_s9 + $0x2b] sm:$0xff]  ;;  %2744 = vst.msk [vmem:[%s6561_s9 + $0x41] sm:$0xff] %vm71_vm0, %v2728_v25  ;;  %v5826_v35 = vpop.permute.xlu1 %3166 }
 0x4e1   :  { %v2917_v42 = vadd.f32 %v5629_v19, %v2853_v30  ;;  %v2785_v31 = vpop.permute.xlu0 %2784  ;;  %v2649_v19 = vld [vmem:[%s6561_s9 + $0x49] sm:$0xff] }
 0x4e2   :  { %3266 = vrot.lane.b32.xlu1 %v5276_v50, %s4307_s8 }
 0x4e3   :  { %2933 = vst.msk [vmem:[%s6561_s9 + $0x2b] sm:$0xff] %vm71_vm0, %v2917_v42  ;;  %3272 = vrot.lane.b32.xlu0 %v5338_v6, %s4307_s8 }
 0x4e4   :  { %v2947_v61 = vld [vmem:[%s6561_s9 + $0x1c] sm:$0xff]  ;;  %v2691_v41 = vpop.permute.xlu1 %2690 }
 0x4e5   :  { %v3011_v50 = vadd.f32 %v5556_v51, %v2947_v61  ;;  %v2729_v43 = vadd.f32 %v2691_v41, %v2649_v19  ;;  %v5844_v29 = vpop.permute.xlu0 %2880 }
 0x4e6   :  { %4287 = shalt.err (!%p4284_p4)
}
 0x4e7   :  { %s4288_s21 = scalar_lea.hbm %s6562_s10, 16 }
 0x4e8   :  { %p4289_p5 = scmp.ne.s32.totalorder %s6562_s10, %s4288_s21  ;;  %p4292_p6 = scmp.lt.u32.totalorder %s4288_s21, %s6562_s10 }
 0x4ea   :  { %p4294_p7 = pnand %p4292_p6, %p4289_p5 }
 0x4ec   :  { %4297 = shalt.err (!%p4294_p7)
}
 0x4ed   :  { %3339 = dma.vmem_to_hbm [thread:$0]  %s3337_s26, 16, %s6562_s10, [#allocation3]   ;;  %3270 = vrot.lane.b32.xlu1 %v5302_v58, %s4307_s8  ;;  %3027 = vst.msk [vmem:[%s6561_s9 + $0x1c] sm:$0xff] %vm71_vm0, %v3011_v50  ;;  %v3136_v6 = vld [vmem:[%s6561_s9 + $0x6] sm:$0xff]  ;;  %v2759_v51 = vld [vmem:[%s6561_s9 + $0x3a] sm:$0xff]  ;;  %v2787_v46 = vpop.permute.xlu1 %2786  ;;  %v5878_v57 = vpop.permute.xlu0 %2976 }
 0x4ee   :  { %2745 = vst.msk [vmem:[%s6561_s9 + $0x49] sm:$0xff] %vm71_vm0, %v2729_v43  ;;  %3276 = vrot.lane.b32.xlu0 %v5364_v13, %s4307_s8  ;;  %v3200_v58 = vadd.f32 %v5525_v39, %v3136_v6  ;;  %v2823_v44 = vadd.f32 %v5735_v8, %v2759_v51  ;;  %v2948_v13 = vld [vmem:[%s6561_s9 + $0x24] sm:$0xff]  ;;  %v2650_v37 = vld [vmem:[%s6561_s9 + $0x51] sm:$0xff] }
 0x4ef   :  { %v3012_v39 = vadd.f32 %v5612_v12, %v2948_v13 }
 0x4f0   :  { %3216 = vst.msk [vmem:[%s6561_s9 + $0x6] sm:$0xff] %vm71_vm0, %v3200_v58  ;;  %2839 = vst.msk [vmem:[%s6561_s9 + $0x3a] sm:$0xff] %vm71_vm0, %v2823_v44 }
 0x4f1   :  { %3274 = vrot.lane.b32.xlu1 %v5328_v2, %s4307_s8  ;;  %v5894_v27 = vpop.permute.xlu1 %2882  ;;  %v5896_v47 = vpop.permute.xlu0 %3072  ;;  %3028 = vst.msk [vmem:[%s6561_s9 + $0x24] sm:$0xff] %vm71_vm0, %v3012_v39 }
 0x4f4   :  { %v3042_v59 = vld [vmem:[%s6561_s9 + $0x15] sm:$0xff] }
 0x4f5   :  { %v2760_v2 = vld [vmem:[%s6561_s9 + $0x42] sm:$0xff]  ;;  %3278 = vrot.lane.b32.xlu1 %v5354_v10, %s4307_s8  ;;  %v3106_v12 = vadd.f32 %v5558_v52, %v3042_v59  ;;  %v5911_v62 = vpop.permute.xlu1 %2978  ;;  %v5924_v10 = vpop.permute.xlu0 %3168 }
 0x4f6   :  { %v2824_v60 = vadd.f32 %v2785_v31, %v2760_v2  ;;  %v2653_v2 = vld [vmem:[%s6561_s9 + $0x69] sm:$0xff] }
 0x4f7   :  { %3122 = vst.msk [vmem:[%s6561_s9 + $0x15] sm:$0xff] %vm71_vm0, %v3106_v12  ;;  %v2854_v63 = vld [vmem:[%s6561_s9 + $0x33] sm:$0xff] }
 0x4f8   :  { %2840 = vst.msk [vmem:[%s6561_s9 + $0x42] sm:$0xff] %vm71_vm0, %v2824_v60  ;;  %v2918_v52 = vadd.f32 %v5714_v0, %v2854_v63  ;;  %v3043_v1 = vld [vmem:[%s6561_s9 + $0x1d] sm:$0xff] }
 0x4f9   :  { %v5931_v49 = vpop.permute.xlu1 %3074  ;;  %v2693_v4 = vpop.permute.xlu0 %2692  ;;  %v3107_v5 = vadd.f32 %v5564_v54, %v3043_v1 }
 0x4fa   :  { %2934 = vst.msk [vmem:[%s6561_s9 + $0x33] sm:$0xff] %vm71_vm0, %v2918_v52  ;;  %v2730_v7 = vadd.f32 %v2693_v4, %v2650_v37 }
 0x4fb   :  { %3123 = vst.msk [vmem:[%s6561_s9 + $0x1d] sm:$0xff] %vm71_vm0, %v3107_v5 }
 0x4fc   :  { %2746 = vst.msk [vmem:[%s6561_s9 + $0x51] sm:$0xff] %vm71_vm0, %v2730_v7 }
 0x4fd   :  { %v5954_v54 = vpop.permute.xlu1 %3170  ;;  %v2789_v18 = vpop.permute.xlu0 %2788 }
 0x4fe   :  { %v3137_v0 = vld [vmem:[%s6561_s9 + $0xe] sm:$0xff] }
 0x4ff   :  { %v2855_v8 = vld [vmem:[%s6561_s9 + $0x3b] sm:$0xff]  ;;  %v3201_v45 = vadd.f32 %v5523_v38, %v3137_v0 }
 0x500   :  { %v2919_v32 = vadd.f32 %v5759_v33, %v2855_v8  ;;  %v2651_v38 = vld [vmem:[%s6561_s9 + $0x59] sm:$0xff] }
 0x501   :  { %3217 = vst.msk [vmem:[%s6561_s9 + $0xe] sm:$0xff] %vm71_vm0, %v3201_v45  ;;  %v2949_v14 = vld [vmem:[%s6561_s9 + $0x2c] sm:$0xff]  ;;  %v2695_v33 = vpop.permute.xlu1 %2694  ;;  %v5973_v17 = vpop.permute.xlu0 %2884 }
 0x502   :  { %2935 = vst.msk [vmem:[%s6561_s9 + $0x3b] sm:$0xff] %vm71_vm0, %v2919_v32  ;;  %v3013_v16 = vadd.f32 %v5648_v23, %v2949_v14  ;;  %v2731_v15 = vadd.f32 %v2695_v33, %v2651_v38  ;;  %v3138_v53 = vld [vmem:[%s6561_s9 + $0x16] sm:$0xff] }
 0x503   :  { %v2761_v36 = vld [vmem:[%s6561_s9 + $0x4a] sm:$0xff]  ;;  %v3202_v23 = vadd.f32 %v5566_v55, %v3138_v53 }
 0x504   :  { %3029 = vst.msk [vmem:[%s6561_s9 + $0x2c] sm:$0xff] %vm71_vm0, %v3013_v16  ;;  %2747 = vst.msk [vmem:[%s6561_s9 + $0x59] sm:$0xff] %vm71_vm0, %v2731_v15  ;;  %v2825_v34 = vadd.f32 %v2787_v46, %v2761_v36  ;;  %v2654_v38 = vld [vmem:[%s6561_s9 + $0x71] sm:$0xff] }
 0x505   :  { %v2791_v3 = vpop.permute.xlu1 %2790  ;;  %v5990_v21 = vpop.permute.xlu0 %2980  ;;  %3218 = vst.msk [vmem:[%s6561_s9 + $0x16] sm:$0xff] %vm71_vm0, %v3202_v23 }
 0x506   :  { %2841 = vst.msk [vmem:[%s6561_s9 + $0x4a] sm:$0xff] %vm71_vm0, %v2825_v34  ;;  %v2655_v34 = vld [vmem:[%s6561_s9 + $0x79] sm:$0xff] }
 0x509   :  { %v2950_v25 = vld [vmem:[%s6561_s9 + $0x34] sm:$0xff]  ;;  %v6004_v30 = vpop.permute.xlu1 %2886  ;;  %v6006_v42 = vpop.permute.xlu0 %3076 }
 0x50a   :  { %v3014_v55 = vadd.f32 %v5737_v9, %v2950_v25 }
 0x50b   :  { %v3044_v31 = vld [vmem:[%s6561_s9 + $0x25] sm:$0xff]  ;;  %v2762_v61 = vld [vmem:[%s6561_s9 + $0x52] sm:$0xff] }
 0x50c   :  { %3030 = vst.msk [vmem:[%s6561_s9 + $0x34] sm:$0xff] %vm71_vm0, %v3014_v55  ;;  %v3108_v19 = vadd.f32 %v5639_v20, %v3044_v31  ;;  %v2826_v9 = vadd.f32 %v2789_v18, %v2762_v61  ;;  %v2652_v20 = vld [vmem:[%s6561_s9 + $0x61] sm:$0xff] }
 0x50d   :  { %v6019_v41 = vpop.permute.xlu1 %2982  ;;  %v2856_v50 = vld [vmem:[%s6561_s9 + $0x43] sm:$0xff]  ;;  %v2697_v43 = vpop.permute.xlu0 %2696 }
 0x50e   :  { %3124 = vst.msk [vmem:[%s6561_s9 + $0x25] sm:$0xff] %vm71_vm0, %v3108_v19  ;;  %2842 = vst.msk [vmem:[%s6561_s9 + $0x52] sm:$0xff] %vm71_vm0, %v2826_v9  ;;  %v2920_v6 = vadd.f32 %v5844_v29, %v2856_v50  ;;  %v2732_v51 = vadd.f32 %v2697_v43, %v2652_v20 }
 0x510   :  { %2936 = vst.msk [vmem:[%s6561_s9 + $0x43] sm:$0xff] %vm71_vm0, %v2920_v6  ;;  %2748 = vst.msk [vmem:[%s6561_s9 + $0x61] sm:$0xff] %vm71_vm0, %v2732_v51 }
 0x511   :  { %v6044_v58 = vpop.permute.xlu1 %3078  ;;  %v2793_v46 = vpop.permute.xlu0 %2792 }
 0x513   :  { %v3045_v44 = vld [vmem:[%s6561_s9 + $0x2d] sm:$0xff] }
 0x514   :  { %v3109_v29 = vadd.f32 %v5669_v40, %v3045_v44 }
 0x515   :  { %v3139_v13 = vld [vmem:[%s6561_s9 + $0x1e] sm:$0xff]  ;;  %v2857_v39 = vld [vmem:[%s6561_s9 + $0x4b] sm:$0xff]  ;;  %v2699_v59 = vpop.permute.xlu1 %2698  ;;  %v6065_v63 = vpop.permute.xlu0 %2888 }
 0x516   :  { %3125 = vst.msk [vmem:[%s6561_s9 + $0x2d] sm:$0xff] %vm71_vm0, %v3109_v29  ;;  %v3203_v40 = vadd.f32 %v5572_v56, %v3139_v13  ;;  %v2921_v12 = vadd.f32 %v5894_v27, %v2857_v39  ;;  %v2733_v60 = vadd.f32 %v2699_v59, %v2653_v2 }
 0x517   :  { %v2763_v52 = vld [vmem:[%s6561_s9 + $0x5a] sm:$0xff] }
 0x518   :  { %3219 = vst.msk [vmem:[%s6561_s9 + $0x1e] sm:$0xff] %vm71_vm0, %v3203_v40  ;;  %2937 = vst.msk [vmem:[%s6561_s9 + $0x4b] sm:$0xff] %vm71_vm0, %v2921_v12  ;;  %v2951_v56 = vld [vmem:[%s6561_s9 + $0x3c] sm:$0xff]  ;;  %v2827_v27 = vadd.f32 %v2791_v3, %v2763_v52 }
 0x519   :  { %2749 = vst.msk [vmem:[%s6561_s9 + $0x69] sm:$0xff] %vm71_vm0, %v2733_v60  ;;  %v2795_v1 = vpop.permute.xlu1 %2794  ;;  %v3015_v37 = vadd.f32 %v5774_v48, %v2951_v56  ;;  %v6086_v4 = vpop.permute.xlu0 %2984 }
 0x51a   :  { %2843 = vst.msk [vmem:[%s6561_s9 + $0x5a] sm:$0xff] %vm71_vm0, %v2827_v27 }
 0x51b   :  { %3031 = vst.msk [vmem:[%s6561_s9 + $0x3c] sm:$0xff] %vm71_vm0, %v3015_v37 }
 0x51d   :  { %v3140_v5 = vld [vmem:[%s6561_s9 + $0x26] sm:$0xff]  ;;  %v6100_v0 = vpop.permute.xlu1 %2890  ;;  %v6102_v48 = vpop.permute.xlu0 %3080 }
 0x51e   :  { %v3204_v7 = vadd.f32 %v5654_v24, %v3140_v5 }
 0x51f   :  { %v2952_v45 = vld [vmem:[%s6561_s9 + $0x44] sm:$0xff] }
 0x520   :  { %3220 = vst.msk [vmem:[%s6561_s9 + $0x26] sm:$0xff] %vm71_vm0, %v3204_v7  ;;  %v2764_v8 = vld [vmem:[%s6561_s9 + $0x62] sm:$0xff]  ;;  %v3016_v24 = vadd.f32 %v5878_v57, %v2952_v45 }
 0x521   :  { %v2828_v32 = vadd.f32 %v2793_v46, %v2764_v8  ;;  %v6115_v18 = vpop.permute.xlu1 %2986  ;;  %v2858_v14 = vld [vmem:[%s6561_s9 + $0x53] sm:$0xff]  ;;  %v2701_v33 = vpop.permute.xlu0 %2700 }
 0x522   :  { %v3046_v57 = vld [vmem:[%s6561_s9 + $0x35] sm:$0xff]  ;;  %3032 = vst.msk [vmem:[%s6561_s9 + $0x44] sm:$0xff] %vm71_vm0, %v3016_v24  ;;  %v2922_v16 = vadd.f32 %v5973_v17, %v2858_v14  ;;  %v2734_v15 = vadd.f32 %v2701_v33, %v2654_v38 }
 0x523   :  { %2844 = vst.msk [vmem:[%s6561_s9 + $0x62] sm:$0xff] %vm71_vm0, %v2828_v32  ;;  %v3110_v53 = vadd.f32 %v5761_v11, %v3046_v57 }
 0x524   :  { %2938 = vst.msk [vmem:[%s6561_s9 + $0x53] sm:$0xff] %vm71_vm0, %v2922_v16  ;;  %2750 = vst.msk [vmem:[%s6561_s9 + $0x71] sm:$0xff] %vm71_vm0, %v2734_v15 }
 0x525   :  { %v6144_v36 = vpop.permute.xlu1 %3082  ;;  %3126 = vst.msk [vmem:[%s6561_s9 + $0x35] sm:$0xff] %vm71_vm0, %v3110_v53  ;;  %v6150_v17 = vpop.permute.xlu0 %3172 }
 0x529   :  { %v2703_v23 = vpop.permute.xlu1 %2702  ;;  %v3047_v3 = vld [vmem:[%s6561_s9 + $0x3d] sm:$0xff]  ;;  %v2797_v31 = vpop.permute.xlu0 %2796 }
 0x52a   :  { %v2859_v11 = vld [vmem:[%s6561_s9 + $0x5b] sm:$0xff]  ;;  %v2735_v55 = vadd.f32 %v2703_v23, %v2655_v34  ;;  %v3111_v61 = vadd.f32 %v5802_v22, %v3047_v3 }
 0x52b   :  { %v2923_v25 = vadd.f32 %v6004_v30, %v2859_v11  ;;  %v2765_v19 = vld [vmem:[%s6561_s9 + $0x6a] sm:$0xff] }
 0x52c   :  { %2751 = vst.msk [vmem:[%s6561_s9 + $0x79] sm:$0xff] %vm71_vm0, %v2735_v55  ;;  %v3141_v30 = vld [vmem:[%s6561_s9 + $0x2e] sm:$0xff]  ;;  %3127 = vst.msk [vmem:[%s6561_s9 + $0x3d] sm:$0xff] %vm71_vm0, %v3111_v61  ;;  %v2829_v9 = vadd.f32 %v2795_v1, %v2765_v19 }
 0x52d   :  { %2939 = vst.msk [vmem:[%s6561_s9 + $0x5b] sm:$0xff] %vm71_vm0, %v2923_v25  ;;  %v2953_v22 = vld [vmem:[%s6561_s9 + $0x4c] sm:$0xff]  ;;  %v2799_v50 = vpop.permute.xlu1 %2798  ;;  %v3205_v20 = vadd.f32 %v5700_v28, %v3141_v30  ;;  %v6186_v6 = vpop.permute.xlu0 %3176 }
 0x52e   :  { %v3017_v43 = vadd.f32 %v5911_v62, %v2953_v22  ;;  %2845 = vst.msk [vmem:[%s6561_s9 + $0x6a] sm:$0xff] %vm71_vm0, %v2829_v9  ;;  %v3232_v62 = vld [vmem:[%s6561_s9 + $0x7] sm:$0xff] }
 0x52f   :  { %3221 = vst.msk [vmem:[%s6561_s9 + $0x2e] sm:$0xff] %vm71_vm0, %v3205_v20  ;;  %v3233_v20 = vld [vmem:[%s6561_s9 + $0xf] sm:$0xff] }
 0x530   :  { %3033 = vst.msk [vmem:[%s6561_s9 + $0x4c] sm:$0xff] %vm71_vm0, %v3017_v43 }
 0x531   :  { %v2895_v28 = vpop.permute.xlu1 %2894  ;;  %v3249_v51 = vpop.permute.xlu0 %3248 }
 0x532   :  { %v3296_v29 = vadd.f32 %v3249_v51, %v3232_v62 }
 0x533   :  { %v2766_v44 = vld [vmem:[%s6561_s9 + $0x72] sm:$0xff]  ;;  %v2767_v46 = vld [vmem:[%s6561_s9 + $0x7a] sm:$0xff] }
 0x534   :  { %v3142_v13 = vld [vmem:[%s6561_s9 + $0x36] sm:$0xff]  ;;  %v2830_v39 = vadd.f32 %v2797_v31, %v2766_v44  ;;  %v2831_v59 = vadd.f32 %v2799_v50, %v2767_v46  ;;  %3312 = vst.msk [vmem:[%s6561_s9 + $0x7] sm:$0xff] %vm71_vm0, %v3296_v29 }
 0x535   :  { %v3206_v2 = vadd.f32 %v5786_v26, %v3142_v13  ;;  %v2954_v40 = vld [vmem:[%s6561_s9 + $0x54] sm:$0xff]  ;;  %v2991_v12 = vpop.permute.xlu1 %2990  ;;  %v2860_v52 = vld [vmem:[%s6561_s9 + $0x63] sm:$0xff]  ;;  %v2893_v26 = vpop.permute.xlu0 %2892 }
 0x536   :  { %v3018_v60 = vadd.f32 %v5990_v21, %v2954_v40  ;;  %2846 = vst.msk [vmem:[%s6561_s9 + $0x72] sm:$0xff] %vm71_vm0, %v2830_v39  ;;  %2847 = vst.msk [vmem:[%s6561_s9 + $0x7a] sm:$0xff] %vm71_vm0, %v2831_v59  ;;  %v2924_v21 = vadd.f32 %v6065_v63, %v2860_v52  ;;  %v3236_v11 = vld [vmem:[%s6561_s9 + $0x27] sm:$0xff] }
 0x537   :  { %v3048_v56 = vld [vmem:[%s6561_s9 + $0x45] sm:$0xff]  ;;  %3222 = vst.msk [vmem:[%s6561_s9 + $0x36] sm:$0xff] %vm71_vm0, %v3206_v2 }
 0x538   :  { %v3112_v27 = vadd.f32 %v5896_v47, %v3048_v56  ;;  %3034 = vst.msk [vmem:[%s6561_s9 + $0x54] sm:$0xff] %vm71_vm0, %v3018_v60  ;;  %2940 = vst.msk [vmem:[%s6561_s9 + $0x63] sm:$0xff] %vm71_vm0, %v2924_v21  ;;  %v3234_v47 = vld [vmem:[%s6561_s9 + $0x17] sm:$0xff] }
 0x539   :  { %v6249_v1 = vpop.permute.xlu1 %3086  ;;  %v3253_v63 = vpop.permute.xlu0 %3252 }
 0x53a   :  { %3128 = vst.msk [vmem:[%s6561_s9 + $0x45] sm:$0xff] %vm71_vm0, %v3112_v27  ;;  %v3298_v37 = vadd.f32 %v3253_v63, %v3234_v47 }
 0x53c   :  { %3314 = vst.msk [vmem:[%s6561_s9 + $0x17] sm:$0xff] %vm71_vm0, %v3298_v37 }
 0x53d   :  { %v2861_v5 = vld [vmem:[%s6561_s9 + $0x6b] sm:$0xff]  ;;  %v2863_v7 = vld [vmem:[%s6561_s9 + $0x7b] sm:$0xff]  ;;  %v2862_v8 = vld [vmem:[%s6561_s9 + $0x73] sm:$0xff]  ;;  %v6271_v45 = vpop.permute.xlu1 %3174  ;;  %v2989_v38 = vpop.permute.xlu0 %2988 }
 0x53e   :  { %v2925_v32 = vadd.f32 %v6100_v0, %v2861_v5  ;;  %v2927_v24 = vadd.f32 %v2895_v28, %v2863_v7  ;;  %v2926_v14 = vadd.f32 %v2893_v26, %v2862_v8  ;;  %v3237_v13 = vld [vmem:[%s6561_s9 + $0x2f] sm:$0xff] }
 0x53f   :  { %v3049_v33 = vld [vmem:[%s6561_s9 + $0x4d] sm:$0xff]  ;;  %v2955_v0 = vld [vmem:[%s6561_s9 + $0x5c] sm:$0xff] }
 0x540   :  { %v3113_v57 = vadd.f32 %v5931_v49, %v3049_v33  ;;  %2941 = vst.msk [vmem:[%s6561_s9 + $0x6b] sm:$0xff] %vm71_vm0, %v2925_v32  ;;  %2943 = vst.msk [vmem:[%s6561_s9 + $0x7b] sm:$0xff] %vm71_vm0, %v2927_v24  ;;  %v3019_v16 = vadd.f32 %v6019_v41, %v2955_v0 }
 0x541   :  { %2942 = vst.msk [vmem:[%s6561_s9 + $0x73] sm:$0xff] %vm71_vm0, %v2926_v14  ;;  %v3143_v49 = vld [vmem:[%s6561_s9 + $0x3e] sm:$0xff]  ;;  %v6297_v15 = vpop.permute.xlu1 %3178  ;;  %v3257_v23 = vpop.permute.xlu0 %3256 }
 0x542   :  { %v3207_v53 = vadd.f32 %v5826_v35, %v3143_v49  ;;  %3129 = vst.msk [vmem:[%s6561_s9 + $0x4d] sm:$0xff] %vm71_vm0, %v3113_v57  ;;  %3035 = vst.msk [vmem:[%s6561_s9 + $0x5c] sm:$0xff] %vm71_vm0, %v3019_v16  ;;  %v3300_v41 = vadd.f32 %v3257_v23, %v3236_v11 }
 0x544   :  { %3223 = vst.msk [vmem:[%s6561_s9 + $0x3e] sm:$0xff] %vm71_vm0, %v3207_v53  ;;  %3316 = vst.msk [vmem:[%s6561_s9 + $0x27] sm:$0xff] %vm71_vm0, %v3300_v41 }
 0x545   :  { %v6319_v35 = vpop.permute.xlu1 %3182  ;;  %v3261_v34 = vpop.permute.xlu0 %3260 }
 0x547   :  { %v2959_v3 = vld [vmem:[%s6561_s9 + $0x7c] sm:$0xff]  ;;  %v2956_v55 = vld [vmem:[%s6561_s9 + $0x64] sm:$0xff] }
 0x548   :  { %v2957_v25 = vld [vmem:[%s6561_s9 + $0x6c] sm:$0xff]  ;;  %v3023_v31 = vadd.f32 %v2991_v12, %v2959_v3  ;;  %v3020_v19 = vadd.f32 %v6086_v4, %v2956_v55  ;;  %v2958_v30 = vld [vmem:[%s6561_s9 + $0x74] sm:$0xff] }
 0x549   :  { %v3021_v61 = vadd.f32 %v6115_v18, %v2957_v25  ;;  %v3144_v22 = vld [vmem:[%s6561_s9 + $0x46] sm:$0xff]  ;;  %v3022_v9 = vadd.f32 %v2989_v38, %v2958_v30  ;;  %v3251_v50 = vpop.permute.xlu1 %3250  ;;  %v3085_v18 = vpop.permute.xlu0 %3084  ;;  %v3050_v28 = vld [vmem:[%s6561_s9 + $0x55] sm:$0xff] }
 0x54a   :  { %v3208_v43 = vadd.f32 %v5924_v10, %v3144_v22  ;;  %3039 = vst.msk [vmem:[%s6561_s9 + $0x7c] sm:$0xff] %vm71_vm0, %v3023_v31  ;;  %3036 = vst.msk [vmem:[%s6561_s9 + $0x64] sm:$0xff] %vm71_vm0, %v3020_v19  ;;  %v3297_v10 = vadd.f32 %v3251_v50, %v3233_v20  ;;  %v3114_v51 = vadd.f32 %v6006_v42, %v3050_v28  ;;  %v3235_v42 = vld [vmem:[%s6561_s9 + $0x1f] sm:$0xff] }
 0x54b   :  { %3037 = vst.msk [vmem:[%s6561_s9 + $0x6c] sm:$0xff] %vm71_vm0, %v3021_v61  ;;  %v3238_v4 = vld [vmem:[%s6561_s9 + $0x37] sm:$0xff]  ;;  %3038 = vst.msk [vmem:[%s6561_s9 + $0x74] sm:$0xff] %vm71_vm0, %v3022_v9 }
 0x54c   :  { %v3302_v62 = vadd.f32 %v3261_v34, %v3238_v4  ;;  %3224 = vst.msk [vmem:[%s6561_s9 + $0x46] sm:$0xff] %vm71_vm0, %v3208_v43  ;;  %3313 = vst.msk [vmem:[%s6561_s9 + $0xf] sm:$0xff] %vm71_vm0, %v3297_v10 }
 0x54d   :  { %v3255_v44 = vpop.permute.xlu1 %3254  ;;  %3130 = vst.msk [vmem:[%s6561_s9 + $0x55] sm:$0xff] %vm71_vm0, %v3114_v51  ;;  %v3265_v29 = vpop.permute.xlu0 %3264 }
 0x54e   :  { %3318 = vst.msk [vmem:[%s6561_s9 + $0x37] sm:$0xff] %vm71_vm0, %v3302_v62  ;;  %v3299_v46 = vadd.f32 %v3255_v44, %v3235_v42 }
 0x550   :  { %3315 = vst.msk [vmem:[%s6561_s9 + $0x1f] sm:$0xff] %vm71_vm0, %v3299_v46 }
 0x551   :  { %v3055_v39 = vld [vmem:[%s6561_s9 + $0x7d] sm:$0xff]  ;;  %v3259_v40 = vpop.permute.xlu1 %3258 }
 0x552   :  { %v3051_v59 = vld [vmem:[%s6561_s9 + $0x5d] sm:$0xff]  ;;  %v3052_v2 = vld [vmem:[%s6561_s9 + $0x65] sm:$0xff]  ;;  %v3119_v12 = vadd.f32 %v6249_v1, %v3055_v39  ;;  %v3053_v26 = vld [vmem:[%s6561_s9 + $0x6d] sm:$0xff]  ;;  %v3301_v21 = vadd.f32 %v3259_v40, %v3237_v13 }
 0x553   :  { %v3115_v60 = vadd.f32 %v6044_v58, %v3051_v59  ;;  %v3116_v52 = vadd.f32 %v6102_v48, %v3052_v2  ;;  %v3054_v56 = vld [vmem:[%s6561_s9 + $0x75] sm:$0xff]  ;;  %v3117_v27 = vadd.f32 %v6144_v36, %v3053_v26  ;;  %v3181_v48 = vpop.permute.xlu0 %3180  ;;  %v3239_v63 = vld [vmem:[%s6561_s9 + $0x3f] sm:$0xff] }
 0x554   :  { %v3118_v47 = vadd.f32 %v3085_v18, %v3054_v56  ;;  %3135 = vst.msk [vmem:[%s6561_s9 + $0x7d] sm:$0xff] %vm71_vm0, %v3119_v12  ;;  %v3145_v58 = vld [vmem:[%s6561_s9 + $0x4e] sm:$0xff]  ;;  %3317 = vst.msk [vmem:[%s6561_s9 + $0x2f] sm:$0xff] %vm71_vm0, %v3301_v21 }
 0x555   :  { %3131 = vst.msk [vmem:[%s6561_s9 + $0x5d] sm:$0xff] %vm71_vm0, %v3115_v60  ;;  %3132 = vst.msk [vmem:[%s6561_s9 + $0x65] sm:$0xff] %vm71_vm0, %v3116_v52  ;;  %v3209_v36 = vadd.f32 %v5954_v54, %v3145_v58  ;;  %v3263_v1 = vpop.permute.xlu1 %3262 }
 0x556   :  { %3133 = vst.msk [vmem:[%s6561_s9 + $0x6d] sm:$0xff] %vm71_vm0, %v3117_v27  ;;  %3134 = vst.msk [vmem:[%s6561_s9 + $0x75] sm:$0xff] %vm71_vm0, %v3118_v47  ;;  %v3303_v37 = vadd.f32 %v3263_v1, %v3239_v63 }
 0x557   :  { %3225 = vst.msk [vmem:[%s6561_s9 + $0x4e] sm:$0xff] %vm71_vm0, %v3209_v36  ;;  %v3269_v7 = vpop.permute.xlu0 %3268 }
 0x558   :  { %3319 = vst.msk [vmem:[%s6561_s9 + $0x3f] sm:$0xff] %vm71_vm0, %v3303_v37 }
 0x559   :  { %v3267_v5 = vpop.permute.xlu1 %3266 }
 0x55b   :  { %v3151_v8 = vld [vmem:[%s6561_s9 + $0x7e] sm:$0xff] }
 0x55c   :  { %v3147_v54 = vld [vmem:[%s6561_s9 + $0x5e] sm:$0xff]  ;;  %v3146_v32 = vld [vmem:[%s6561_s9 + $0x56] sm:$0xff]  ;;  %v3215_v14 = vadd.f32 %v6319_v35, %v3151_v8 }
 0x55d   :  { %v3211_v24 = vadd.f32 %v6271_v45, %v3147_v54  ;;  %v3150_v38 = vld [vmem:[%s6561_s9 + $0x76] sm:$0xff]  ;;  %v3210_v33 = vadd.f32 %v6150_v17, %v3146_v32  ;;  %v3148_v57 = vld [vmem:[%s6561_s9 + $0x66] sm:$0xff]  ;;  %v3149_v0 = vld [vmem:[%s6561_s9 + $0x6e] sm:$0xff] }
 0x55e   :  { %v3214_v49 = vadd.f32 %v3181_v48, %v3150_v38  ;;  %v3212_v16 = vadd.f32 %v6186_v6, %v3148_v57  ;;  %v3213_v45 = vadd.f32 %v6297_v15, %v3149_v0  ;;  %3231 = vst.msk [vmem:[%s6561_s9 + $0x7e] sm:$0xff] %vm71_vm0, %v3215_v14  ;;  %v3240_v17 = vld [vmem:[%s6561_s9 + $0x47] sm:$0xff]  ;;  %v3273_v15 = vpop.permute.xlu0 %3272 }
 0x55f   :  { %v3271_v53 = vpop.permute.xlu1 %3270  ;;  %3227 = vst.msk [vmem:[%s6561_s9 + $0x5e] sm:$0xff] %vm71_vm0, %v3211_v24  ;;  %3226 = vst.msk [vmem:[%s6561_s9 + $0x56] sm:$0xff] %vm71_vm0, %v3210_v33  ;;  %v3304_v6 = vadd.f32 %v3265_v29, %v3240_v17 }
 0x560   :  { %3230 = vst.msk [vmem:[%s6561_s9 + $0x76] sm:$0xff] %vm71_vm0, %v3214_v49  ;;  %3228 = vst.msk [vmem:[%s6561_s9 + $0x66] sm:$0xff] %vm71_vm0, %v3212_v16 }
 0x561   :  { %3229 = vst.msk [vmem:[%s6561_s9 + $0x6e] sm:$0xff] %vm71_vm0, %v3213_v45  ;;  %3320 = vst.msk [vmem:[%s6561_s9 + $0x47] sm:$0xff] %vm71_vm0, %v3304_v6 }
 0x562   :  { %v3277_v19 = vpop.permute.xlu0 %3276 }
 0x563   :  { %v3275_v11 = vpop.permute.xlu1 %3274 }
 0x565   :  { %v3247_v34 = vld [vmem:[%s6561_s9 + $0x7f] sm:$0xff] }
 0x566   :  { %v3242_v23 = vld [vmem:[%s6561_s9 + $0x57] sm:$0xff]  ;;  %v3241_v41 = vld [vmem:[%s6561_s9 + $0x4f] sm:$0xff] }
 0x567   :  { %v3279_v35 = vpop.permute.xlu1 %3278  ;;  %v3306_v3 = vadd.f32 %v3269_v7, %v3242_v23  ;;  %v3305_v25 = vadd.f32 %v3267_v5, %v3241_v41  ;;  %v3243_v31 = vld [vmem:[%s6561_s9 + $0x5f] sm:$0xff]  ;;  %v3246_v61 = vld [vmem:[%s6561_s9 + $0x77] sm:$0xff] }
 0x568   :  { %v3244_v55 = vld [vmem:[%s6561_s9 + $0x67] sm:$0xff]  ;;  %v3311_v30 = vadd.f32 %v3279_v35, %v3247_v34  ;;  %v3307_v9 = vadd.f32 %v3271_v53, %v3243_v31  ;;  %v3310_v50 = vadd.f32 %v3277_v19, %v3246_v61  ;;  %v3245_v20 = vld [vmem:[%s6561_s9 + $0x6f] sm:$0xff] }
 0x569   :  { %v3308_v22 = vadd.f32 %v3273_v15, %v3244_v55  ;;  %3322 = vst.msk [vmem:[%s6561_s9 + $0x57] sm:$0xff] %vm71_vm0, %v3306_v3  ;;  %3321 = vst.msk [vmem:[%s6561_s9 + $0x4f] sm:$0xff] %vm71_vm0, %v3305_v25  ;;  %v3309_v43 = vadd.f32 %v3275_v11, %v3245_v20 }
 0x56a   :  { %3327 = vst.msk [vmem:[%s6561_s9 + $0x7f] sm:$0xff] %vm71_vm0, %v3311_v30  ;;  %3323 = vst.msk [vmem:[%s6561_s9 + $0x5f] sm:$0xff] %vm71_vm0, %v3307_v9 }
 0x56b   :  { %3324 = vst.msk [vmem:[%s6561_s9 + $0x67] sm:$0xff] %vm71_vm0, %v3308_v22  ;;  %3326 = vst.msk [vmem:[%s6561_s9 + $0x77] sm:$0xff] %vm71_vm0, %v3310_v50 }
 0x56c   :  { %3325 = vst.msk [vmem:[%s6561_s9 + $0x6f] sm:$0xff] %vm71_vm0, %v3309_v43 }
 0x56d   :  { %4298 = dma.done.wait [#allocation3], 16  }
 0x56e   :  { %4299 = vsyncadd [#allocation3], 4294967280 }
 0x56f   :  { %3345 = vsyncpa [#allocation3], 1 }

</bundles_post_ra>
